<compile_context>
chip_gen: v7x
topology: tpu7x:2x2x1
jax: 0.10.0
libtpu: 0.0.40
codegen_flags: <defaults>
</compile_context>

<pallas_src>
import random

import jax
import jax.numpy as jnp
from jax.experimental import pallas as pl
from jax.experimental.pallas import tpu as pltpu


def _round_up(x, m):
    return ((x + m - 1) // m) * m


# ---------------------------------------------------------------------------
# In-kernel helper: LSTM gate activation + state update.  Gate order i, f, g, o
# (PyTorch).  `gates` is (Bp, 4*Hp), already = x@W_ih + h@W_hh + b.
# ---------------------------------------------------------------------------
def _apply_gates(gates, c_prev):
    Hp = c_prev.shape[-1]
    i_g = jax.nn.sigmoid(gates[:, 0 * Hp:1 * Hp])
    f_g = jax.nn.sigmoid(gates[:, 1 * Hp:2 * Hp])
    g_g = jnp.tanh(gates[:, 2 * Hp:3 * Hp])
    o_g = jax.nn.sigmoid(gates[:, 3 * Hp:4 * Hp])
    c_new = f_g * c_prev + i_g * g_g
    h_new = o_g * jnp.tanh(c_new)
    return h_new, c_new


# ---------------------------------------------------------------------------
# Encoder kernel: grid = (src_len,), state in VMEM scratch, weights resident.
# Layer-0 input projection (emb @ W_ih0 + b0) is precomputed outside; only the
# recurrent h @ W_hh halves run per step.  Also emits enc @ W_att_enc + b_att.
# ---------------------------------------------------------------------------
def _encoder_kernel(xp_ref, whh0_ref, wih1_ref, whh1_ref, b1_ref, wae_ref, ba_ref,
                    enc_ref, eproj_ref, h_fin_ref, c_fin_ref,
                    h_scr, c_scr):
    t = pl.program_id(0)

    @pl.when(t == 0)
    def _init():
        h_scr[...] = jnp.zeros_like(h_scr)
        c_scr[...] = jnp.zeros_like(c_scr)

    # layer 0: non-recurrent x @ W_ih0 + b0 was hoisted out of the time loop
    gates0 = xp_ref[0] + jnp.dot(h_scr[0], whh0_ref[...],
                                 preferred_element_type=jnp.float32)
    h0, c0 = _apply_gates(gates0, c_scr[0])

    # layer 1: two separate dots (no per-step lane-dim concat)
    gates1 = (jnp.dot(h0, wih1_ref[...], preferred_element_type=jnp.float32)
              + jnp.dot(h_scr[1], whh1_ref[...], preferred_element_type=jnp.float32)
              + b1_ref[...])
    h1, c1 = _apply_gates(gates1, c_scr[1])

    h_scr[0] = h0
    c_scr[0] = c0
    h_scr[1] = h1
    c_scr[1] = c1

    enc_ref[0] = h1                                               # top-layer output
    # attention encoder projection computed here (rides the otherwise idle MXU),
    # so the decoder never recomputes it.
    eproj_ref[0] = (jnp.dot(h1, wae_ref[...], preferred_element_type=jnp.float32)
                    + ba_ref[...])

    @pl.when(t == pl.num_programs(0) - 1)
    def _final():                                                 # final (h, c) per layer
        h_fin_ref[...] = h_scr[...]
        c_fin_ref[...] = c_scr[...]


def run_encoder(src_xp, whh0, wih1, whh1, b1, wae, ba):
    S, Bp, G = src_xp.shape                                       # G = 4*Hp
    Hp = whh0.shape[0]

    def const2(t):
        return (0, 0)

    return pl.pallas_call(
        _encoder_kernel,
        out_shape=(jax.ShapeDtypeStruct((S, Bp, Hp), jnp.float32),   # enc outputs
                   jax.ShapeDtypeStruct((S, Bp, Hp), jnp.float32),   # enc @ W_att_enc + b
                   jax.ShapeDtypeStruct((2, Bp, Hp), jnp.float32),   # final h
                   jax.ShapeDtypeStruct((2, Bp, Hp), jnp.float32)),  # final c
        grid_spec=pltpu.PrefetchScalarGridSpec(
            num_scalar_prefetch=0,
            grid=(S,),
            in_specs=[
                pl.BlockSpec((1, Bp, G), lambda t: (t, 0, 0)),    # per-step layer-0 x-proj
                pl.BlockSpec(whh0.shape, const2),                 # resident weights
                pl.BlockSpec(wih1.shape, const2),
                pl.BlockSpec(whh1.shape, const2),
                pl.BlockSpec(b1.shape, const2),
                pl.BlockSpec(wae.shape, const2),
                pl.BlockSpec(ba.shape, const2),
            ],
            out_specs=(
                pl.BlockSpec((1, Bp, Hp), lambda t: (t, 0, 0)),
                pl.BlockSpec((1, Bp, Hp), lambda t: (t, 0, 0)),
                pl.BlockSpec((2, Bp, Hp), lambda t: (0, 0, 0)),
                pl.BlockSpec((2, Bp, Hp), lambda t: (0, 0, 0)),
            ),
            scratch_shapes=[
                pltpu.VMEM((2, Bp, Hp), jnp.float32),             # h state (2 layers)
                pltpu.VMEM((2, Bp, Hp), jnp.float32),             # c state
            ]),
        compiler_params=pltpu.CompilerParams(
            dimension_semantics=("arbitrary",)),
    )(src_xp, whh0, wih1, whh1, b1, wae, ba)


# ---------------------------------------------------------------------------
# Decoder kernel: grid = (tgt_len - 1,).  Per step:
#   layer-0 input proj = teacher-forced (precomputed slab) OR, only when not
#   teacher forcing (pl.when), one-hot(argmax(prev logits)) @ projected-emb table;
#   2-layer LSTM (recurrent halves only) -> additive attention over enc outputs
#   (projection precomputed by the encoder) -> output projection.
# ---------------------------------------------------------------------------
def _decoder_kernel(tf_ref,                                       # SMEM (T-1,) prefetch
                    tfxp_ref, enc_ref, eproj_ref, h_init_ref, c_init_ref, embxp_ref,
                    whh0_ref, wih1_ref, whh1_ref, b1_ref,
                    wad_ref, v_ref, wod_ref, woc_ref, bo_ref,
                    out_ref,
                    h_scr, c_scr, prev_scr, x0p_scr):
    i = pl.program_id(0)
    S, Bp, Hp = enc_ref.shape
    Vp = bo_ref.shape[-1]

    @pl.when(i == 0)
    def _init():
        h_scr[...] = h_init_ref[...]                              # encoder final states
        c_scr[...] = c_init_ref[...]

    # ---- decoder layer-0 input projection ----
    x0p_scr[...] = tfxp_ref[0]                                    # teacher-forced (precomputed)

    @pl.when(tf_ref[i] == 0)                                      # greedy path only when needed
    def _greedy():
        prev = prev_scr[...]                                      # (Bp, Vp) prev-step logits
        lane = jax.lax.broadcasted_iota(jnp.int32, (Bp, Vp), 1)
        mx = jnp.max(prev, axis=1, keepdims=True)
        first_max = jnp.min(jnp.where(prev == mx, lane, Vp), axis=1, keepdims=True)
        one_hot = (lane == first_max).astype(jnp.float32)         # (Bp, Vp)
        # embxp table already holds dec_emb @ W_ih0 + b0, so the bias rides the one-hot.
        x0p_scr[...] = jnp.dot(one_hot, embxp_ref[...],
                               preferred_element_type=jnp.float32)

    # ---- 2-layer LSTM: only the recurrent halves run per step ----
    gates0 = x0p_scr[...] + jnp.dot(h_scr[0], whh0_ref[...],
                                    preferred_element_type=jnp.float32)
    h0, c0 = _apply_gates(gates0, c_scr[0])
    gates1 = (jnp.dot(h0, wih1_ref[...], preferred_element_type=jnp.float32)
              + jnp.dot(h_scr[1], whh1_ref[...], preferred_element_type=jnp.float32)
              + b1_ref[...])
    h1, c1 = _apply_gates(gates1, c_scr[1])
    h_scr[0] = h0
    c_scr[0] = c0
    h_scr[1] = h1
    c_scr[1] = c1

    # ---- additive attention over encoder outputs ((S, Bp, Hp) layout) ----
    dec_proj = jnp.dot(h1, wad_ref[...], preferred_element_type=jnp.float32)   # (Bp, Hp)
    energy = jnp.tanh(dec_proj[None, :, :] + eproj_ref[...])      # (S, Bp, Hp)
    # TODO(synk): at production S/H the reductions below should become MXU
    # dot_general contractions; at S=8, Hp=128 the VPU/XLU path is fine.
    scores = jnp.sum(energy * v_ref[...][None, :, :], axis=-1)    # (S, Bp)
    scores = scores - jnp.max(scores, axis=0, keepdims=True)
    e = jnp.exp(scores)
    attn = e / jnp.sum(e, axis=0, keepdims=True)                  # softmax over src seq
    context = jnp.sum(attn[:, :, None] * enc_ref[...], axis=0)    # (Bp, Hp)

    # ---- output projection (intended Linear(2H, V), split dec/context halves) ----
    logits = (jnp.dot(h1, wod_ref[...], preferred_element_type=jnp.float32)
              + jnp.dot(context, woc_ref[...], preferred_element_type=jnp.float32)
              + bo_ref[...])                                      # (Bp, Vp)
    prev_scr[...] = logits
    out_ref[0] = logits


def run_decoder(tf_flags, tgt_xp, enc_sbh, eproj_sbh, h_init, c_init, emb_xp,
                whh0, wih1, whh1, b1, wad, v, wod, woc, bo):
    T1, Bp, G = tgt_xp.shape                                      # G = 4*Hp
    S = enc_sbh.shape[0]
    Hp = whh0.shape[0]
    Vp = bo.shape[-1]

    def step3(i, *_):
        return (i, 0, 0)

    def const3(i, *_):
        return (0, 0, 0)

    def const2(i, *_):
        return (0, 0)

    return pl.pallas_call(
        _decoder_kernel,
        out_shape=jax.ShapeDtypeStruct((T1, Bp, Vp), jnp.float32),
        grid_spec=pltpu.PrefetchScalarGridSpec(
            num_scalar_prefetch=1,
            grid=(T1,),
            in_specs=[
                pl.BlockSpec((1, Bp, G), step3),                  # teacher-forced layer-0 x-proj
                pl.BlockSpec((S, Bp, Hp), const3),                # encoder outputs
                pl.BlockSpec((S, Bp, Hp), const3),                # enc @ W_att_enc + b_att
                pl.BlockSpec((2, Bp, Hp), const3),                # init h
                pl.BlockSpec((2, Bp, Hp), const3),                # init c
                pl.BlockSpec(emb_xp.shape, const2),               # dec emb @ W_ih0 + b0 table
                pl.BlockSpec(whh0.shape, const2),
                pl.BlockSpec(wih1.shape, const2),
                pl.BlockSpec(whh1.shape, const2),
                pl.BlockSpec(b1.shape, const2),
                pl.BlockSpec(wad.shape, const2),
                pl.BlockSpec(v.shape, const2),
                pl.BlockSpec(wod.shape, const2),
                pl.BlockSpec(woc.shape, const2),
                pl.BlockSpec(bo.shape, const2),
            ],
            out_specs=pl.BlockSpec((1, Bp, Vp), step3),
            scratch_shapes=[
                pltpu.VMEM((2, Bp, Hp), jnp.float32),             # h state
                pltpu.VMEM((2, Bp, Hp), jnp.float32),             # c state
                pltpu.VMEM((Bp, Vp), jnp.float32),                # prev-step logits
                pltpu.VMEM((Bp, 4 * Hp), jnp.float32),            # selected layer-0 x-proj
            ]),
        compiler_params=pltpu.CompilerParams(
            dimension_semantics=("arbitrary",)),
    )(tf_flags, tgt_xp, enc_sbh, eproj_sbh, h_init, c_init, emb_xp,
      whh0, wih1, whh1, b1, wad, v, wod, woc, bo)


# ---------------------------------------------------------------------------
# Parameter init (PyTorch-style uniform(-1/sqrt(H), 1/sqrt(H))) + tile padding
# + hoisted layer-0 projection tables.
# ---------------------------------------------------------------------------
def init_params(key, input_vocab, output_vocab, hidden, num_layers):
    scale = 1.0 / float(hidden) ** 0.5

    def u(k, shape):
        return jax.random.uniform(k, shape, jnp.float32, -scale, scale)

    keys = iter(jax.random.split(key, 64))
    p = {}
    p["enc_emb"] = u(next(keys), (input_vocab, hidden))
    p["dec_emb"] = u(next(keys), (output_vocab, hidden))
    for name in ("enc", "dec"):
        wih, whh, b = [], [], []
        for _ in range(num_layers):
            wih.append(u(next(keys), (hidden, 4 * hidden)))
            whh.append(u(next(keys), (hidden, 4 * hidden)))
            b.append(u(next(keys), (1, 4 * hidden)) + u(next(keys), (1, 4 * hidden)))
        p[name + "_wih"], p[name + "_whh"], p[name + "_b"] = wih, whh, b

    p["w_att_dec"] = u(next(keys), (hidden, hidden))
    p["w_att_enc"] = u(next(keys), (hidden, hidden))
    p["b_att"] = u(next(keys), (1, hidden))
    p["v"] = u(next(keys), (1, hidden))
    # TODO(synk): reference declares output_proj = nn.Linear(H, V) but applies it to a
    # 2H-wide concat (shape bug that would raise in PyTorch); we implement the intended
    # Linear(2H, V), split into decoder- and context-halves.
    p["w_out_dec"] = u(next(keys), (hidden, output_vocab))
    p["w_out_ctx"] = u(next(keys), (hidden, output_vocab))
    p["b_out"] = u(next(keys), (1, output_vocab))
    return p


def _pad_to(x, shape, value=0.0):
    pads = [(0, s - d) for d, s in zip(x.shape, shape)]
    return jnp.pad(x, pads, constant_values=value)


def pad_params(p, hidden, output_vocab, num_layers):
    H, V = hidden, output_vocab
    Hp = _round_up(H, 128)
    Vp = _round_up(V, 128)

    def pad_gate_cols(w, rows_p):
        # (rows, 4H) -> (rows_p, 4*Hp): each gate block is 128-lane aligned.
        parts = [_pad_to(w[:, g * H:(g + 1) * H], (rows_p, Hp)) for g in range(4)]
        return jnp.concatenate(parts, axis=1)

    q = {"H": H, "V": V, "Hp": Hp, "Vp": Vp}
    enc_emb = _pad_to(p["enc_emb"], (p["enc_emb"].shape[0], Hp))
    dec_emb = _pad_to(p["dec_emb"], (Vp, Hp))
    for name in ("enc", "dec"):
        wih, whh, bs = [], [], []
        for l in range(num_layers):
            wih.append(pad_gate_cols(p[name + "_wih"][l], Hp))    # (Hp, 4Hp)
            whh.append(pad_gate_cols(p[name + "_whh"][l], Hp))    # (Hp, 4Hp)
            bs.append(pad_gate_cols(p[name + "_b"][l], 1))        # (1, 4Hp)
        q[name + "_wih"], q[name + "_whh"], q[name + "_b"] = wih, whh, bs

    # Hoisted non-recurrent layer-0 projection: fold embedding + x@W_ih0 + b0 into
    # per-token tables (gathered host-side for teacher-forced tokens; used as a
    # one-hot matmul table for the in-kernel greedy path).
    q["enc_emb_xp"] = jnp.dot(enc_emb, q["enc_wih"][0]) + q["enc_b"][0]   # (in_vocab, 4Hp)
    q["dec_emb_xp"] = jnp.dot(dec_emb, q["dec_wih"][0]) + q["dec_b"][0]   # (Vp, 4Hp)

    q["w_att_dec"] = _pad_to(p["w_att_dec"], (Hp, Hp))
    q["w_att_enc"] = _pad_to(p["w_att_enc"], (Hp, Hp))
    q["b_att"] = _pad_to(p["b_att"], (1, Hp))
    q["v"] = _pad_to(p["v"], (1, Hp))
    q["w_out_dec"] = _pad_to(p["w_out_dec"], (Hp, Vp))
    q["w_out_ctx"] = _pad_to(p["w_out_ctx"], (Hp, Vp))
    # Padded vocab columns get a very negative bias so the in-kernel greedy argmax
    # never selects them (they are sliced off outside anyway).
    q["b_out"] = _pad_to(p["b_out"], (1, Vp), value=-1e9)
    return q


# ---------------------------------------------------------------------------
# Full forward pass: 2 fused pallas_calls + cheap XLA layout plumbing.
# ---------------------------------------------------------------------------
def seq2seq_forward(pp, src, tgt, teacher_forcing_ratio=0.5):
    assert len(pp["enc_whh"]) == 2, "kernels are specialized to num_layers=2"
    B, src_len = src.shape
    tgt_len = tgt.shape[1]
    V = pp["V"]
    Bp = _round_up(B, 8)

    # ---- encoder ----
    # Hoisted layer-0 projection: one gather from a pre-projected (vocab, 4Hp)
    # table, already in time-leading (S, Bp, 4Hp) layout (only the tiny int token
    # array is transposed; no big activation transposes between kernels).
    src_xp = jnp.take(pp["enc_emb_xp"], src.T, axis=0)            # (S, B, 4Hp)
    src_xp = jnp.pad(src_xp, ((0, 0), (0, Bp - B), (0, 0)))       # (S, Bp, 4Hp)
    enc_sbh, eproj_sbh, h_fin, c_fin = run_encoder(
        src_xp, pp["enc_whh"][0], pp["enc_wih"][1], pp["enc_whh"][1], pp["enc_b"][1],
        pp["w_att_enc"], pp["b_att"])

    # ---- decoder ----
    # Teacher-forcing pattern drawn host-side (trace-time), deterministic stand-in
    # for torch's per-step random.random(); step 0's input is always tgt[:, 0].
    rng = random.Random(0)
    tf_list = [1]
    for _ in range(1, tgt_len - 1):
        tf_list.append(1 if rng.random() < teacher_forcing_ratio else 0)
    tf_flags = jnp.asarray(tf_list, dtype=jnp.int32)              # (tgt_len-1,)

    tf_tokens = tgt[:, : tgt_len - 1]                             # (B, T-1)
    tgt_xp = jnp.take(pp["dec_emb_xp"], tf_tokens.T, axis=0)      # (T-1, B, 4Hp)
    tgt_xp = jnp.pad(tgt_xp, ((0, 0), (0, Bp - B), (0, 0)))       # (T-1, Bp, 4Hp)

    step_logits = run_decoder(
        tf_flags, tgt_xp, enc_sbh, eproj_sbh, h_fin, c_fin, pp["dec_emb_xp"],
        pp["dec_whh"][0], pp["dec_wih"][1], pp["dec_whh"][1], pp["dec_b"][1],
        pp["w_att_dec"], pp["v"], pp["w_out_dec"], pp["w_out_ctx"], pp["b_out"])

    logits = step_logits[:, :B, :V]                               # (T-1, B, V)
    out = jnp.concatenate([jnp.zeros((1, B, V), jnp.float32), logits], axis=0)
    return jnp.transpose(out, (1, 0, 2))                          # (B, tgt_len, V)


if __name__ == "__main__":
    key = jax.random.PRNGKey(0)
    B, src_len, tgt_len = 2, 8, 8
    H, num_layers = 32, 2
    input_vocab, output_vocab = 16, 16

    k_p, k_s, k_t = jax.random.split(key, 3)
    params = init_params(k_p, input_vocab, output_vocab, H, num_layers)
    pp = pad_params(params, H, output_vocab, num_layers)
    src = jax.random.randint(k_s, (B, src_len), 0, input_vocab, dtype=jnp.int32)
    tgt = jax.random.randint(k_t, (B, tgt_len), 0, output_vocab, dtype=jnp.int32)

    out = seq2seq_forward(pp, src, tgt, teacher_forcing_ratio=0.5)
    out = jax.block_until_ready(out)
    assert out.shape == (B, tgt_len, output_vocab)
    assert bool(jnp.all(jnp.isfinite(out)))
    print("KERNEL_OK")
</pallas_src>

<mosaic_0001>
module attributes {stable_mosaic.version = 11 : i64} {
  func.func @_encoder_kernel(%arg0: i32, %arg1: memref<1x8x512xf32, #tpu.memory_space<vmem>>, %arg2: memref<128x512xf32, #tpu.memory_space<vmem>>, %arg3: memref<128x512xf32, #tpu.memory_space<vmem>>, %arg4: memref<128x512xf32, #tpu.memory_space<vmem>>, %arg5: memref<1x512xf32, #tpu.memory_space<vmem>>, %arg6: memref<128x128xf32, #tpu.memory_space<vmem>>, %arg7: memref<1x128xf32, #tpu.memory_space<vmem>>, %arg8: memref<1x8x128xf32, #tpu.memory_space<vmem>>, %arg9: memref<1x8x128xf32, #tpu.memory_space<vmem>>, %arg10: memref<2x8x128xf32, #tpu.memory_space<vmem>>, %arg11: memref<2x8x128xf32, #tpu.memory_space<vmem>>, %arg12: memref<2x8x128xf32, #tpu.memory_space<vmem>>, %arg13: memref<2x8x128xf32, #tpu.memory_space<vmem>>) attributes {dimension_semantics = [#tpu.dimension_semantics<arbitrary>], iteration_bounds = array<i64: 8>, scalar_prefetch = 0 : i64, scratch_operands = 2 : i64, tpu.core_type = #tpu.core_type<tc>, window_params = [{transform_indices = @transform_0, window_bounds = array<i64: 1, 8, 512>}, {pipeline_mode = #tpu.pipeline_mode<synchronous>, transform_indices = @transform_1, window_bounds = array<i64: 128, 512>}, {pipeline_mode = #tpu.pipeline_mode<synchronous>, transform_indices = @transform_2, window_bounds = array<i64: 128, 512>}, {pipeline_mode = #tpu.pipeline_mode<synchronous>, transform_indices = @transform_3, window_bounds = array<i64: 128, 512>}, {pipeline_mode = #tpu.pipeline_mode<synchronous>, transform_indices = @transform_4, window_bounds = array<i64: 1, 512>}, {pipeline_mode = #tpu.pipeline_mode<synchronous>, transform_indices = @transform_5, window_bounds = array<i64: 128, 128>}, {pipeline_mode = #tpu.pipeline_mode<synchronous>, transform_indices = @transform_6, window_bounds = array<i64: 1, 128>}, {transform_indices = @transform_7, window_bounds = array<i64: 1, 8, 128>}, {transform_indices = @transform_8, window_bounds = array<i64: 1, 8, 128>}, {pipeline_mode = #tpu.pipeline_mode<synchronous>, transform_indices = @transform_9, window_bounds = array<i64: 2, 8, 128>}, {pipeline_mode = #tpu.pipeline_mode<synchronous>, transform_indices = @transform_10, window_bounds = array<i64: 2, 8, 128>}]} {
    %c0_i32 = arith.constant 0 : i32
    %0 = arith.cmpi eq, %arg0, %c0_i32 : i32
    %1 = arith.extui %0 : i1 to i32
    %c0_i32_0 = arith.constant 0 : i32
    %2 = arith.cmpi ne, %1, %c0_i32_0 : i32
    scf.if %2 {
      %cst_54 = arith.constant 0.000000e+00 : f32
      %100 = vector.broadcast %cst_54 : f32 to vector<2x8x128xf32>
      %c0_55 = arith.constant 0 : index
      %c0_56 = arith.constant 0 : index
      %c0_57 = arith.constant 0 : index
      %101 = vector.load %arg12[%c0_55, %c0_56, %c0_57] : memref<2x8x128xf32, #tpu.memory_space<vmem>>, vector<2x8x128xf32>
      tpu.vector_store %arg12[%c0_55, %c0_56, %c0_57], %100 {strides = array<i32>} : memref<2x8x128xf32, #tpu.memory_space<vmem>>, vector<2x8x128xf32>,
      %cst_58 = arith.constant 0.000000e+00 : f32
      %102 = vector.broadcast %cst_58 : f32 to vector<2x8x128xf32>
      %c0_59 = arith.constant 0 : index
      %c0_60 = arith.constant 0 : index
      %c0_61 = arith.constant 0 : index
      %103 = vector.load %arg13[%c0_59, %c0_60, %c0_61] : memref<2x8x128xf32, #tpu.memory_space<vmem>>, vector<2x8x128xf32>
      tpu.vector_store %arg13[%c0_59, %c0_60, %c0_61], %102 {strides = array<i32>} : memref<2x8x128xf32, #tpu.memory_space<vmem>>, vector<2x8x128xf32>,
    } else {
    }
    %c0 = arith.constant 0 : index
    %c0_1 = arith.constant 0 : index
    %c0_2 = arith.constant 0 : index
    %3 = vector.load %arg1[%c0, %c0_1, %c0_2] : memref<1x8x512xf32, #tpu.memory_space<vmem>>, vector<1x8x512xf32>
    %4 = vector.shape_cast %3 : vector<1x8x512xf32> to vector<8x512xf32>
    %c0_3 = arith.constant 0 : index
    %c0_4 = arith.constant 0 : index
    %c0_5 = arith.constant 0 : index
    %5 = vector.load %arg12[%c0_3, %c0_4, %c0_5] : memref<2x8x128xf32, #tpu.memory_space<vmem>>, vector<1x8x128xf32>
    %6 = vector.shape_cast %5 : vector<1x8x128xf32> to vector<8x128xf32>
    %c0_6 = arith.constant 0 : index
    %c0_7 = arith.constant 0 : index
    %7 = vector.load %arg2[%c0_6, %c0_7] : memref<128x512xf32, #tpu.memory_space<vmem>>, vector<128x512xf32>
    %cst = arith.constant dense<0.000000e+00> : vector<8x512xf32>
    %8 = tpu.matmul %6, %7, %cst {dimension_numbers = #tpu.dot_dimension_numbers<[1], [0], [0], [1], [0, 0, 1, 1], [], []>} : vector<8x128xf32>, vector<128x512xf32>, vector<8x512xf32> -> vector<8x512xf32>
    %9 = arith.addf %4, %8 : vector<8x512xf32>
    %c0_8 = arith.constant 0 : index
    %c0_9 = arith.constant 0 : index
    %c0_10 = arith.constant 0 : index
    %10 = vector.load %arg13[%c0_8, %c0_9, %c0_10] : memref<2x8x128xf32, #tpu.memory_space<vmem>>, vector<1x8x128xf32>
    %11 = vector.shape_cast %10 : vector<1x8x128xf32> to vector<8x128xf32>
    %12 = vector.extract_strided_slice %9 {offsets = [0, 0], sizes = [8, 128], strides = [1, 1]} : vector<8x512xf32> to vector<8x128xf32>
    %13 = arith.negf %12 : vector<8x128xf32>
    %14 = math.exp %13 : vector<8x128xf32>
    %cst_11 = arith.constant 1.000000e+00 : f32
    %15 = vector.broadcast %cst_11 : f32 to vector<8x128xf32>
    %16 = arith.addf %15, %14 : vector<8x128xf32>
    %17 = arith.divf %15, %16 : vector<8x128xf32>
    %18 = vector.extract_strided_slice %9 {offsets = [0, 128], sizes = [8, 128], strides = [1, 1]} : vector<8x512xf32> to vector<8x128xf32>
    %19 = arith.negf %18 : vector<8x128xf32>
    %20 = math.exp %19 : vector<8x128xf32>
    %cst_12 = arith.constant 1.000000e+00 : f32
    %21 = vector.broadcast %cst_12 : f32 to vector<8x128xf32>
    %22 = arith.addf %21, %20 : vector<8x128xf32>
    %23 = arith.divf %21, %22 : vector<8x128xf32>
    %24 = vector.extract_strided_slice %9 {offsets = [0, 256], sizes = [8, 128], strides = [1, 1]} : vector<8x512xf32> to vector<8x128xf32>
    %25 = math.tanh %24 : vector<8x128xf32>
    %26 = vector.extract_strided_slice %9 {offsets = [0, 384], sizes = [8, 128], strides = [1, 1]} : vector<8x512xf32> to vector<8x128xf32>
    %27 = arith.negf %26 : vector<8x128xf32>
    %28 = math.exp %27 : vector<8x128xf32>
    %cst_13 = arith.constant 1.000000e+00 : f32
    %29 = vector.broadcast %cst_13 : f32 to vector<8x128xf32>
    %30 = arith.addf %29, %28 : vector<8x128xf32>
    %31 = arith.divf %29, %30 : vector<8x128xf32>
    %32 = arith.mulf %23, %11 : vector<8x128xf32>
    %33 = arith.mulf %17, %25 : vector<8x128xf32>
    %34 = arith.addf %32, %33 : vector<8x128xf32>
    %35 = math.tanh %34 : vector<8x128xf32>
    %36 = arith.mulf %31, %35 : vector<8x128xf32>
    %c0_14 = arith.constant 0 : index
    %c0_15 = arith.constant 0 : index
    %37 = vector.load %arg3[%c0_14, %c0_15] : memref<128x512xf32, #tpu.memory_space<vmem>>, vector<128x512xf32>
    %cst_16 = arith.constant dense<0.000000e+00> : vector<8x512xf32>
    %38 = tpu.matmul %36, %37, %cst_16 {dimension_numbers = #tpu.dot_dimension_numbers<[1], [0], [0], [1], [0, 0, 1, 1], [], []>} : vector<8x128xf32>, vector<128x512xf32>, vector<8x512xf32> -> vector<8x512xf32>
    %c1 = arith.constant 1 : index
    %c0_17 = arith.constant 0 : index
    %c0_18 = arith.constant 0 : index
    %39 = vector.load %arg12[%c1, %c0_17, %c0_18] : memref<2x8x128xf32, #tpu.memory_space<vmem>>, vector<1x8x128xf32>
    %40 = vector.shape_cast %39 : vector<1x8x128xf32> to vector<8x128xf32>
    %c0_19 = arith.constant 0 : index
    %c0_20 = arith.constant 0 : index
    %41 = vector.load %arg4[%c0_19, %c0_20] : memref<128x512xf32, #tpu.memory_space<vmem>>, vector<128x512xf32>
    %cst_21 = arith.constant dense<0.000000e+00> : vector<8x512xf32>
    %42 = tpu.matmul %40, %41, %cst_21 {dimension_numbers = #tpu.dot_dimension_numbers<[1], [0], [0], [1], [0, 0, 1, 1], [], []>} : vector<8x128xf32>, vector<128x512xf32>, vector<8x512xf32> -> vector<8x512xf32>
    %43 = arith.addf %38, %42 : vector<8x512xf32>
    %c0_22 = arith.constant 0 : index
    %c0_23 = arith.constant 0 : index
    %44 = vector.load %arg5[%c0_22, %c0_23] : memref<1x512xf32, #tpu.memory_space<vmem>>, vector<1x512xf32>
    %45 = vector.broadcast %44 : vector<1x512xf32> to vector<8x512xf32>
    %46 = arith.addf %43, %45 : vector<8x512xf32>
    %c1_24 = arith.constant 1 : index
    %c0_25 = arith.constant 0 : index
    %c0_26 = arith.constant 0 : index
    %47 = vector.load %arg13[%c1_24, %c0_25, %c0_26] : memref<2x8x128xf32, #tpu.memory_space<vmem>>, vector<1x8x128xf32>
    %48 = vector.shape_cast %47 : vector<1x8x128xf32> to vector<8x128xf32>
    %49 = vector.extract_strided_slice %46 {offsets = [0, 0], sizes = [8, 128], strides = [1, 1]} : vector<8x512xf32> to vector<8x128xf32>
    %50 = arith.negf %49 : vector<8x128xf32>
    %51 = math.exp %50 : vector<8x128xf32>
    %cst_27 = arith.constant 1.000000e+00 : f32
    %52 = vector.broadcast %cst_27 : f32 to vector<8x128xf32>
    %53 = arith.addf %52, %51 : vector<8x128xf32>
    %54 = arith.divf %52, %53 : vector<8x128xf32>
    %55 = vector.extract_strided_slice %46 {offsets = [0, 128], sizes = [8, 128], strides = [1, 1]} : vector<8x512xf32> to vector<8x128xf32>
    %56 = arith.negf %55 : vector<8x128xf32>
    %57 = math.exp %56 : vector<8x128xf32>
    %cst_28 = arith.constant 1.000000e+00 : f32
    %58 = vector.broadcast %cst_28 : f32 to vector<8x128xf32>
    %59 = arith.addf %58, %57 : vector<8x128xf32>
    %60 = arith.divf %58, %59 : vector<8x128xf32>
    %61 = vector.extract_strided_slice %46 {offsets = [0, 256], sizes = [8, 128], strides = [1, 1]} : vector<8x512xf32> to vector<8x128xf32>
    %62 = math.tanh %61 : vector<8x128xf32>
    %63 = vector.extract_strided_slice %46 {offsets = [0, 384], sizes = [8, 128], strides = [1, 1]} : vector<8x512xf32> to vector<8x128xf32>
    %64 = arith.negf %63 : vector<8x128xf32>
    %65 = math.exp %64 : vector<8x128xf32>
    %cst_29 = arith.constant 1.000000e+00 : f32
    %66 = vector.broadcast %cst_29 : f32 to vector<8x128xf32>
    %67 = arith.addf %66, %65 : vector<8x128xf32>
    %68 = arith.divf %66, %67 : vector<8x128xf32>
    %69 = arith.mulf %60, %48 : vector<8x128xf32>
    %70 = arith.mulf %54, %62 : vector<8x128xf32>
    %71 = arith.addf %69, %70 : vector<8x128xf32>
    %72 = math.tanh %71 : vector<8x128xf32>
    %73 = arith.mulf %68, %72 : vector<8x128xf32>
    %c0_30 = arith.constant 0 : index
    %c0_31 = arith.constant 0 : index
    %c0_32 = arith.constant 0 : index
    %74 = vector.load %arg12[%c0_30, %c0_31, %c0_32] : memref<2x8x128xf32, #tpu.memory_space<vmem>>, vector<1x8x128xf32>
    %75 = vector.shape_cast %74 : vector<1x8x128xf32> to vector<8x128xf32>
    %76 = vector.shape_cast %36 : vector<8x128xf32> to vector<1x8x128xf32>
    tpu.vector_store %arg12[%c0_30, %c0_31, %c0_32], %76 {strides = array<i32>} : memref<2x8x128xf32, #tpu.memory_space<vmem>>, vector<1x8x128xf32>,
    %c0_33 = arith.constant 0 : index
    %c0_34 = arith.constant 0 : index
    %c0_35 = arith.constant 0 : index
    %77 = vector.load %arg13[%c0_33, %c0_34, %c0_35] : memref<2x8x128xf32, #tpu.memory_space<vmem>>, vector<1x8x128xf32>
    %78 = vector.shape_cast %77 : vector<1x8x128xf32> to vector<8x128xf32>
    %79 = vector.shape_cast %34 : vector<8x128xf32> to vector<1x8x128xf32>
    tpu.vector_store %arg13[%c0_33, %c0_34, %c0_35], %79 {strides = array<i32>} : memref<2x8x128xf32, #tpu.memory_space<vmem>>, vector<1x8x128xf32>,
    %c1_36 = arith.constant 1 : index
    %c0_37 = arith.constant 0 : index
    %c0_38 = arith.constant 0 : index
    %80 = vector.load %arg12[%c1_36, %c0_37, %c0_38] : memref<2x8x128xf32, #tpu.memory_space<vmem>>, vector<1x8x128xf32>
    %81 = vector.shape_cast %80 : vector<1x8x128xf32> to vector<8x128xf32>
    %82 = vector.shape_cast %73 : vector<8x128xf32> to vector<1x8x128xf32>
    tpu.vector_store %arg12[%c1_36, %c0_37, %c0_38], %82 {strides = array<i32>} : memref<2x8x128xf32, #tpu.memory_space<vmem>>, vector<1x8x128xf32>,
    %c1_39 = arith.constant 1 : index
    %c0_40 = arith.constant 0 : index
    %c0_41 = arith.constant 0 : index
    %83 = vector.load %arg13[%c1_39, %c0_40, %c0_41] : memref<2x8x128xf32, #tpu.memory_space<vmem>>, vector<1x8x128xf32>
    %84 = vector.shape_cast %83 : vector<1x8x128xf32> to vector<8x128xf32>
    %85 = vector.shape_cast %71 : vector<8x128xf32> to vector<1x8x128xf32>
    tpu.vector_store %arg13[%c1_39, %c0_40, %c0_41], %85 {strides = array<i32>} : memref<2x8x128xf32, #tpu.memory_space<vmem>>, vector<1x8x128xf32>,
    %c0_42 = arith.constant 0 : index
    %c0_43 = arith.constant 0 : index
    %c0_44 = arith.constant 0 : index
    %86 = vector.load %arg8[%c0_42, %c0_43, %c0_44] : memref<1x8x128xf32, #tpu.memory_space<vmem>>, vector<1x8x128xf32>
    %87 = vector.shape_cast %86 : vector<1x8x128xf32> to vector<8x128xf32>
    %88 = vector.shape_cast %73 : vector<8x128xf32> to vector<1x8x128xf32>
    tpu.vector_store %arg8[%c0_42, %c0_43, %c0_44], %88 {strides = array<i32>} : memref<1x8x128xf32, #tpu.memory_space<vmem>>, vector<1x8x128xf32>,
    %c0_45 = arith.constant 0 : index
    %c0_46 = arith.constant 0 : index
    %89 = vector.load %arg6[%c0_45, %c0_46] : memref<128x128xf32, #tpu.memory_space<vmem>>, vector<128x128xf32>
    %cst_47 = arith.constant dense<0.000000e+00> : vector<8x128xf32>
    %90 = tpu.matmul %73, %89, %cst_47 {dimension_numbers = #tpu.dot_dimension_numbers<[1], [0], [0], [1], [0, 0, 1, 1], [], []>} : vector<8x128xf32>, vector<128x128xf32>, vector<8x128xf32> -> vector<8x128xf32>
    %c0_48 = arith.constant 0 : index
    %c0_49 = arith.constant 0 : index
    %91 = vector.load %arg7[%c0_48, %c0_49] : memref<1x128xf32, #tpu.memory_space<vmem>>, vector<1x128xf32>
    %92 = vector.broadcast %91 : vector<1x128xf32> to vector<8x128xf32>
    %93 = arith.addf %90, %92 : vector<8x128xf32>
    %c0_50 = arith.constant 0 : index
    %c0_51 = arith.constant 0 : index
    %c0_52 = arith.constant 0 : index
    %94 = vector.load %arg9[%c0_50, %c0_51, %c0_52] : memref<1x8x128xf32, #tpu.memory_space<vmem>>, vector<1x8x128xf32>
    %95 = vector.shape_cast %94 : vector<1x8x128xf32> to vector<8x128xf32>
    %96 = vector.shape_cast %93 : vector<8x128xf32> to vector<1x8x128xf32>
    tpu.vector_store %arg9[%c0_50, %c0_51, %c0_52], %96 {strides = array<i32>} : memref<1x8x128xf32, #tpu.memory_space<vmem>>, vector<1x8x128xf32>,
    %c7_i32 = arith.constant 7 : i32
    %97 = arith.cmpi eq, %arg0, %c7_i32 : i32
    %98 = arith.extui %97 : i1 to i32
    %c0_i32_53 = arith.constant 0 : i32
    %99 = arith.cmpi ne, %98, %c0_i32_53 : i32
    scf.if %99 {
      %c0_54 = arith.constant 0 : index
      %c0_55 = arith.constant 0 : index
      %c0_56 = arith.constant 0 : index
      %100 = vector.load %arg12[%c0_54, %c0_55, %c0_56] : memref<2x8x128xf32, #tpu.memory_space<vmem>>, vector<2x8x128xf32>
      %c0_57 = arith.constant 0 : index
      %c0_58 = arith.constant 0 : index
      %c0_59 = arith.constant 0 : index
      %101 = vector.load %arg10[%c0_57, %c0_58, %c0_59] : memref<2x8x128xf32, #tpu.memory_space<vmem>>, vector<2x8x128xf32>
      tpu.vector_store %arg10[%c0_57, %c0_58, %c0_59], %100 {strides = array<i32>} : memref<2x8x128xf32, #tpu.memory_space<vmem>>, vector<2x8x128xf32>,
      %c0_60 = arith.constant 0 : index
      %c0_61 = arith.constant 0 : index
      %c0_62 = arith.constant 0 : index
      %102 = vector.load %arg13[%c0_60, %c0_61, %c0_62] : memref<2x8x128xf32, #tpu.memory_space<vmem>>, vector<2x8x128xf32>
      %c0_63 = arith.constant 0 : index
      %c0_64 = arith.constant 0 : index
      %c0_65 = arith.constant 0 : index
      %103 = vector.load %arg11[%c0_63, %c0_64, %c0_65] : memref<2x8x128xf32, #tpu.memory_space<vmem>>, vector<2x8x128xf32>
      tpu.vector_store %arg11[%c0_63, %c0_64, %c0_65], %102 {strides = array<i32>} : memref<2x8x128xf32, #tpu.memory_space<vmem>>, vector<2x8x128xf32>,
    } else {
    }
    return
  }
  func.func @transform_0(%arg0: i32) -> (i32, i32, i32) {
    %c0_i32 = arith.constant 0 : i32
    %c0_i32_0 = arith.constant 0 : i32
    %c0_i32_1 = arith.constant 0 : i32
    return %arg0, %c0_i32, %c0_i32_0 : i32, i32, i32
  }
  func.func @transform_1(%arg0: i32) -> (i32, i32) {
    %c0_i32 = arith.constant 0 : i32
    %c0_i32_0 = arith.constant 0 : i32
    %c0_i32_1 = arith.constant 0 : i32
    return %c0_i32, %c0_i32_0 : i32, i32
  }
  func.func @transform_2(%arg0: i32) -> (i32, i32) {
    %c0_i32 = arith.constant 0 : i32
    %c0_i32_0 = arith.constant 0 : i32
    %c0_i32_1 = arith.constant 0 : i32
    return %c0_i32, %c0_i32_0 : i32, i32
  }
  func.func @transform_3(%arg0: i32) -> (i32, i32) {
    %c0_i32 = arith.constant 0 : i32
    %c0_i32_0 = arith.constant 0 : i32
    %c0_i32_1 = arith.constant 0 : i32
    return %c0_i32, %c0_i32_0 : i32, i32
  }
  func.func @transform_4(%arg0: i32) -> (i32, i32) {
    %c0_i32 = arith.constant 0 : i32
    %c0_i32_0 = arith.constant 0 : i32
    %c0_i32_1 = arith.constant 0 : i32
    return %c0_i32, %c0_i32_0 : i32, i32
  }
  func.func @transform_5(%arg0: i32) -> (i32, i32) {
    %c0_i32 = arith.constant 0 : i32
    %c0_i32_0 = arith.constant 0 : i32
    %c0_i32_1 = arith.constant 0 : i32
    return %c0_i32, %c0_i32_0 : i32, i32
  }
  func.func @transform_6(%arg0: i32) -> (i32, i32) {
    %c0_i32 = arith.constant 0 : i32
    %c0_i32_0 = arith.constant 0 : i32
    %c0_i32_1 = arith.constant 0 : i32
    return %c0_i32, %c0_i32_0 : i32, i32
  }
  func.func @transform_7(%arg0: i32) -> (i32, i32, i32) {
    %c0_i32 = arith.constant 0 : i32
    %c0_i32_0 = arith.constant 0 : i32
    %c0_i32_1 = arith.constant 0 : i32
    return %arg0, %c0_i32, %c0_i32_0 : i32, i32, i32
  }
  func.func @transform_8(%arg0: i32) -> (i32, i32, i32) {
    %c0_i32 = arith.constant 0 : i32
    %c0_i32_0 = arith.constant 0 : i32
    %c0_i32_1 = arith.constant 0 : i32
    return %arg0, %c0_i32, %c0_i32_0 : i32, i32, i32
  }
  func.func @transform_9(%arg0: i32) -> (i32, i32, i32) {
    %c0_i32 = arith.constant 0 : i32
    %c0_i32_0 = arith.constant 0 : i32
    %c0_i32_1 = arith.constant 0 : i32
    %c0_i32_2 = arith.constant 0 : i32
    return %c0_i32, %c0_i32_0, %c0_i32_1 : i32, i32, i32
  }
  func.func @transform_10(%arg0: i32) -> (i32, i32, i32) {
    %c0_i32 = arith.constant 0 : i32
    %c0_i32_0 = arith.constant 0 : i32
    %c0_i32_1 = arith.constant 0 : i32
    %c0_i32_2 = arith.constant 0 : i32
    return %c0_i32, %c0_i32_0, %c0_i32_1 : i32, i32, i32
  }
}

</mosaic_0001>

<bundles_post_ra>
// kernel: tpu_custom_call.1
= control target key start
LH: loop header
LB: loop body
LE: loop exit
PB: predicated region body
PF: predicated region fallthrough
CT: control target
= control target key end

     0   :  { %s2727_s0 = inlined_call_operand.hbm [shape: f32[8,8,512], index: 0, kind: input, shape index: {}]   ;;  %s2728_s1 = inlined_call_operand.hbm [shape: f32[128,512], index: 1, kind: input, shape index: {}]   ;;  %s2729_s2 = inlined_call_operand.hbm [shape: f32[128,512], index: 2, kind: input, shape index: {}]   ;;  %s2730_s3 = inlined_call_operand.hbm [shape: f32[128,512], index: 3, kind: input, shape index: {}]   ;;  %s2731_s4 = inlined_call_operand.vmem [shape: f32[1,512], index: 4, kind: input, shape index: {}]   ;;  %s2732_s5 = inlined_call_operand.hbm [shape: f32[128,128], index: 5, kind: input, shape index: {}]   ;;  %s2733_s6 = inlined_call_operand.vmem [shape: f32[1,128], index: 6, kind: input, shape index: {}]   ;;  %s2734_s7 = inlined_call_operand.hbm [shape: f32[8,8,128], index: 7, kind: output, shape index: {0}]   ;;  %s2735_s8 = inlined_call_operand.hbm [shape: f32[8,8,128], index: 8, kind: output, shape index: {1}]   ;;  %s2736_s9 = inlined_call_operand.hbm [shape: f32[2,8,128], index: 9, kind: output, shape index: {2}]   ;;  %s2737_s10 = inlined_call_operand.hbm [shape: f32[2,8,128], index: 10, kind: output, shape index: {3}]  }
   0x1   :  { %2745 = sst [smem:[#allocation26_spill]] %s2728_s1 }
   0x2   :  { %2746 = sst [smem:[#allocation27_spill]] %s2736_s9 }
   0x3   :  { %2747 = sst [smem:[#allocation28_spill]] %s2737_s10 }
   0x4   :  { %16 = vsyncpa [#allocation5], 0 }
   0x5   :  { %18 = vsyncpa [#allocation5 + $0x1], 0 }
   0x6   :  { %19 = vsyncpa [#allocation8], 0 }
   0x7   :  { %20 = vsyncpa [#allocation11], 0 }
   0x8   :  { %21 = vsyncpa [#allocation6], 0 }
   0x9   :  { %23 = vsyncpa [#allocation6 + $0x1], 0 }
   0xa   :  { %24 = vsyncpa [#allocation15], 0 }
   0xb   :  { %26 = vsyncpa [#allocation15 + $0x1], 0 }
   0xc   :  { %27 = vsyncpa [#allocation18], 0  ;;  %s2326_s13 = smov 0   ;;  %s2328_s14 = smov 0  }
   0xd   :  { %s2330_s15 = smov 0   ;;  %s2332_s16 = smov 0  }
   0xe LB: > { %s2252_s17 = smov [#allocation7]   ;;  %s2347_s19 = sadd.s32 4294967295, %s2250_s16   ;;  %s2250_s16 = sphi %s2332_s16, %s2782_s16   ;;  %s2246_s15 = sphi %s2330_s15, %s2781_s15   ;;  %s2242_s14 = sphi %s2328_s14, %s2780_s14   ;;  %s2238_s13 = sphi %s2326_s13, %s2779_s13  }
   0xf   : > { %s296_s18 = sshll.u32 %s2252_s17, 4  ;;  %p1485_p0 = scmp.ge.s32.totalorder %s2250_s16, 1  ;;  %s2353_s18 = int_to_ptr.vmem [resolvable:$true] %s296_s18 }
  0x10   : > { %p2740_p1 = scmp.eq.s32.totalorder %s2347_s19, 0  ;;  %p284_p2 = scmp.lt.s32.totalorder %s2250_s16, 9 }
  0x11   : > { %s2253_s21 = smov [#allocation10]   ;;  %s2254_s24 = smov [#allocation9]  }
  0x12   : > { %p2355_p4 = pnand %p1485_p0, %p284_p2  ;;  %s322_s22 = sshll.u32 %s2253_s21, 4  ;;  %s2367_s22 = int_to_ptr.vmem [resolvable:$true] %s322_s22 }
  0x13   : > { %s309_s25 = sshll.u32 %s2254_s24, 4  ;;  %s2750_s1 = sld [smem:[#allocation26_spill]]  ;;  %s2369_s25 = int_to_ptr.vmem [resolvable:$true] %s309_s25 }
  0x14   : > { %s2748_s20 = scalar_select %p2355_p4, 1, 0 }
  0x15   : > { %p1824_p5 = pneg %p2355_p4 }
  0x17   : > { %p2363_p6 = pnand %p1824_p5, %p2740_p1 }
  0x19   : > { %s1942_s28 = scalar_lea.hbm %s2750_s1, 8192  ;;  %p2379_p8 = pneg %p2363_p6 }
  0x1a   : > { %p1943_p7 = scmp.ne.s32.totalorder %s2750_s1, %s1942_s28  ;;  %p1949_p11 = scmp.lt.u32.totalorder %s1942_s28, %s2750_s1 }
  0x1c   : > { %p1945_p9 = pnand %p2379_p8, %p1943_p7 }
  0x1e   : > { %p1946_p10 = pneg %p1945_p9 }
  0x20   : > { %p1951_p12 = pnand %p1949_p11, %p1946_p10 }
  0x22   : > { %1954 = shalt.err (!%p1951_p12)
}
  0x23   : > { %s1955_s21 = scalar_lea.vmem %s2353_s18, 8192  ;;  %p1963_p5 = scmp.lt.s32.totalorder %s2353_s18, %s2353_s18 }
  0x24   : > { %p1956_p13 = scmp.ne.s32.totalorder %s2353_s18, %s1955_s21  ;;  %p1964_p3 = scmp.lt.s32.totalorder %s1955_s21, %s1955_s21 }
  0x26   : > { %p1958_p0 = pnand %p1956_p13, %p2379_p8  ;;  %p1965_p7 = por %p1964_p3, %p1963_p5 }
  0x28   : > { %p1959_p2 = pneg %p1958_p0 }
  0x2a   : > { %p1966_p9 = pnand %p1965_p7, %p1959_p2 }
  0x2c   : > { %1969 = shalt.err (!%p1966_p9)
}
  0x2d   : > { %s2255_s24 = smov 512   ;;  %s2256_s26 = smov 32  }
  0x2e   : > { %1827 = dma.hbm_to_vmem [thread:$0]  (!%p2363_p6), %s2750_s1, 8192, %s2353_s18, [#allocation8], %s2255_s24, %s2255_s24, %s2256_s26  }
  0x2f   : > { %s1970_s12 = scalar_lea.hbm %s2730_s3, 8192 }
  0x30   : > { %p1971_p3 = scmp.ne.s32.totalorder %s2730_s3, %s1970_s12  ;;  %p1977_p12 = scmp.lt.u32.totalorder %s1970_s12, %s2730_s3 }
  0x32   : > { %p1973_p10 = pnand %p1971_p3, %p2379_p8 }
  0x34   : > { %p1974_p11 = pneg %p1973_p10 }
  0x36   : > { %p1979_p13 = pnand %p1977_p12, %p1974_p11 }
  0x38   : > { %1982 = shalt.err (!%p1979_p13)
}
  0x39   : > { %s1983_s18 = scalar_lea.vmem %s2367_s22, 8192  ;;  %p1991_p7 = scmp.lt.s32.totalorder %s2367_s22, %s2367_s22 }
  0x3a   : > { %p1984_p0 = scmp.ne.s32.totalorder %s2367_s22, %s1983_s18  ;;  %p1992_p9 = scmp.lt.s32.totalorder %s1983_s18, %s1983_s18 }
  0x3c   : > { %p1986_p2 = pnand %p1984_p0, %p2379_p8  ;;  %p1993_p3 = por %p1992_p9, %p1991_p7 }
  0x3e   : > { %p1987_p5 = pneg %p1986_p2 }
  0x40   : > { %p1994_p10 = pnand %p1993_p3, %p1987_p5 }
  0x42   : > { %1997 = shalt.err (!%p1994_p10)
}
  0x43   : > { %1833 = dma.hbm_to_vmem [thread:$0]  (!%p2363_p6), %s2730_s3, 8192, %s2367_s22, [#allocation11], %s2255_s24, %s2255_s24, %s2256_s26  }
  0x44   : > { %s1998_s29 = scalar_lea.hbm %s2729_s2, 8192 }
  0x45   : > { %p1999_p11 = scmp.ne.s32.totalorder %s2729_s2, %s1998_s29  ;;  %p2005_p0 = scmp.lt.u32.totalorder %s1998_s29, %s2729_s2 }
  0x47   : > { %p2001_p12 = pnand %p1999_p11, %p2379_p8 }
  0x49   : > { %p2002_p13 = pneg %p2001_p12 }
  0x4b   : > { %p2007_p2 = pnand %p2005_p0, %p2002_p13 }
  0x4d   : > { %2010 = shalt.err (!%p2007_p2)
}
  0x4e   : > { %s2011_s22 = scalar_lea.vmem %s2369_s25, 8192  ;;  %p2019_p3 = scmp.lt.s32.totalorder %s2369_s25, %s2369_s25 }
  0x4f   : > { %p2012_p5 = scmp.ne.s32.totalorder %s2369_s25, %s2011_s22  ;;  %p2020_p10 = scmp.lt.s32.totalorder %s2011_s22, %s2011_s22 }
  0x51   : > { %p2014_p7 = pnand %p2012_p5, %p2379_p8  ;;  %p2021_p11 = por %p2020_p10, %p2019_p3 }
  0x53   : > { %p2015_p9 = pneg %p2014_p7 }
  0x55   : > { %p2022_p12 = pnand %p2021_p11, %p2015_p9 }
  0x57   : > { %2025 = shalt.err (!%p2022_p12)
}
  0x58   : > { %1830 = dma.hbm_to_vmem [thread:$0]  (!%p2363_p6), %s2729_s2, 8192, %s2369_s25, [#allocation8], %s2255_s24, %s2255_s24, %s2256_s26  }
  0x59   : > { %s2257_s10 = smov [#allocation12]   ;;  %s2026_s30 = scalar_lea.hbm %s2732_s5, 2048 }
  0x5a   : > { %s338_s27 = sshll.u32 %s2257_s10, 4  ;;  %p2027_p13 = scmp.ne.s32.totalorder %s2732_s5, %s2026_s30  ;;  %s339_s27 = int_to_ptr.vmem [resolvable:$true] %s338_s27 }
  0x5b   : > { %p2033_p5 = scmp.lt.u32.totalorder %s2026_s30, %s2732_s5 }
  0x5c   : > { %p2029_p0 = pnand %p2027_p13, %p2379_p8 }
  0x5e   : > { %p2030_p2 = pneg %p2029_p0 }
  0x60   : > { %p2035_p7 = pnand %p2033_p5, %p2030_p2 }
  0x62   : > { %2038 = shalt.err (!%p2035_p7)
}
  0x63   : > { %s2039_s25 = scalar_lea.vmem %s339_s27, 2048  ;;  %p2047_p11 = scmp.lt.s32.totalorder %s339_s27, %s339_s27 }
  0x64   : > { %p2040_p9 = scmp.ne.s32.totalorder %s339_s27, %s2039_s25  ;;  %p2048_p12 = scmp.lt.s32.totalorder %s2039_s25, %s2039_s25 }
  0x66   : > { %p2042_p3 = pnand %p2040_p9, %p2379_p8  ;;  %p2049_p1 = por %p2048_p12, %p2047_p11 }
  0x68   : > { %p2043_p10 = pneg %p2042_p3 }
  0x6a   : > { %p2050_p4 = pnand %p2049_p1, %p2043_p10 }
  0x6c   : > { %2053 = shalt.err (!%p2050_p4)
}
  0x6d   : > { %s2258_s24 = smov 128   ;;  %s2259_s11 = smov 8  }
  0x6e   : > { %1836 = dma.hbm_to_vmem [thread:$0]  (!%p2363_p6), %s2732_s5, 2048, %s339_s27, [#allocation11], %s2258_s24, %s2258_s24, %s2259_s11  }
  0x6f   : > { %s2742_s9 = sadd.s32 4294967294, %s2250_s16   ;;  %s2475_s10 = sadd.s32 1, %s2250_s16  }
  0x70   : > { %s37_s28 = ssub.s32 %s2250_s16, %s2475_s10  ;;  %s40_s29 = sadd.s32 1, %s2246_s15 }
  0x71   : > { %p38_p1 = scmp.eq.s32.totalorder %s37_s28, 0  ;;  %p47_p4 = scmp.ne.s32.totalorder %s2246_s15, %s2242_s14 }
  0x72   : > { %p48_p8 = scmp.eq.s32.totalorder %s2250_s16, 0  ;;  %p53_p13 = scmp.ne.s32.totalorder %s2242_s14, %s2238_s13 }
  0x73   : > { %s2486_s30 = scalar_select %p38_p1, %s2246_s15, %s40_s29  }
  0x74   : > { %p2488_p0 = por %p48_p8, %p47_p4  ;;  %p2753_p2 = scmp.eq.s32.totalorder %s2347_s19, 0 }
  0x75   : > { %p2743_p5 = scmp.eq.s32.totalorder %s2347_s19, 7  ;;  %p209_p7 = scmp.eq.s32.totalorder %s2742_s9, 7 }
  0x76   : > { %p2494_p6 = por %p2753_p2, %p53_p13  ;;  %p1852_p9 = scmp.lt.s32.totalorder %s2250_s16, 8 }
  0x77   : > { %s355_s12 = sand.u32 1, %s2246_s15   ;;  %p2505_p3 = por %p2743_p5, %p47_p4 }
  0x78   : > { %p2509_p10 = por %p209_p7, %p53_p13  ;;  %s1491_s22 = sshll.u32 %s355_s12, 5 }
  0x79   : > { %s2755_s17 = scalar_select %p2505_p3, 1, 0 }
  0x7a   : > { %s2756_s21 = scalar_select %p2509_p10, 1, 0 }
  0x7b   : > { %s1521_s25 = sshll.u32 %s2250_s16, 9  ;;  %s359_s18 = scalar_lea.vmem [#allocation4], %s1491_s22 }
  0x7c   : > { %s2517_s26 = scalar_lea.hbm %s2727_s0, %s1521_s25  ;;  %s367_s28 = sshll.u32 %s359_s18, 4  ;;  %s2519_s28 = int_to_ptr.vmem [resolvable:$true] %s367_s28 }
  0x7d   : > { %p2523_p11 = pnand %p1852_p9, %p2488_p0  ;;  %s356_s9 = scalar_lea.sflag [#allocation5], %s355_s12 }
  0x7e   : > { %s2054_s1 = scalar_lea.hbm %s2517_s26, 512  ;;  %s2059_s24 = scalar_lea.hbm %s2727_s0, 4096 }
  0x7f   : > { %p2055_p12 = scmp.ne.s32.totalorder %s2517_s26, %s2054_s1  ;;  %p2056_p1 = pneg %p2523_p11 }
  0x80   : > { %p2060_p13 = scmp.lt.u32.totalorder %s2517_s26, %s2727_s0  ;;  %p2061_p0 = scmp.lt.u32.totalorder %s2059_s24, %s2054_s1 }
  0x81   : > { %p2057_p4 = pnand %p2056_p1, %p2055_p12  ;;  %p2063_p7 = scmp.lt.u32.totalorder %s2054_s1, %s2517_s26 }
  0x82   : > { %p2062_p2 = por %p2061_p0, %p2060_p13 }
  0x83   : > { %p2058_p8 = pneg %p2057_p4 }
  0x84   : > { %p2064_p9 = por %p2063_p7, %p2062_p2 }
  0x86   : > { %p2065_p5 = pnand %p2064_p9, %p2058_p8 }
  0x88   : > { %2068 = shalt.err (!%p2065_p5)
}
  0x89   : > { %s2069_s12 = scalar_lea.vmem %s2519_s28, 512  ;;  %s2260_s18 = smov [#allocation4]  }
  0x8a   : > { %p2070_p12 = scmp.ne.s32.totalorder %s2519_s28, %s2069_s12  ;;  %s2074_s22 = sshll.u32 %s2260_s18, 4  ;;  %s2075_s22 = int_to_ptr.vmem [resolvable:$false] %s2074_s22 }
  0x8b   : > { %s2076_s25 = scalar_lea.vmem %s2075_s22, 1024  ;;  %p2077_p3 = scmp.lt.s32.totalorder %s2519_s28, %s2075_s22 }
  0x8c   : > { %p2072_p4 = pnand %p2070_p12, %p2056_p1  ;;  %p2078_p13 = scmp.lt.s32.totalorder %s2076_s25, %s2069_s12 }
  0x8e   : > { %p2073_p10 = pneg %p2072_p4  ;;  %p2079_p0 = por %p2078_p13, %p2077_p3 }
  0x90   : > { %p2080_p2 = pnand %p2079_p0, %p2073_p10 }
  0x92   : > { %2083 = shalt.err (!%p2080_p2)
}
  0x93   : > { %1840 = dma.hbm_to_vmem [thread:$0]  (!%p2523_p11), %s2517_s26, 512, %s2519_s28, %s356_s9  }
  0x94   : > { %p2758_p5 = scmp.ne.s32.totalorder %s2748_s20, 0 }
  0x95   : > { %s2555_s1 = sand.u32 (!%p2758_p5), 1, %s2242_s14  }
  0x96   : > { %376 = sbr.rel (%p2758_p5) target bundleno = 1057 (0x421), region = 48  ;;  %s1495_s24 = sshll.u32 (!%p2758_p5), %s2555_s1, 5 }
  0x97   : > { %s379_s23 = scalar_lea.sflag (!%p2758_p5), [#allocation5], %s2555_s1  ;;  %s2559_s11 = scalar_lea.vmem (!%p2758_p5), [#allocation4], %s1495_s24 }
  0x9d   : > { %2209 = dma.done.wait (%p2494_p6), %s379_s23, 512  }
  0x9e   : > { %2211 = vsyncadd (%p2494_p6), %s379_s23, 4294966784  ;;  %p2759_p3 = scmp.eq.s32.totalorder %s2347_s19, 0 }
  0xa0   : > { %2213 = dma.done.wait (%p2759_p3), [#allocation8], 16384   ;;  %p2760_p10 = pmov %p2759_p3 }
  0xa1   : > { %p2761_p11 = pmov %p2759_p3 }
  0xa2   : > { %2215 = vsyncadd (%p2760_p10), [#allocation8], 4294950912 }
  0xa3   : > { %2217 = dma.done.wait (%p2761_p11), [#allocation11], 10240   ;;  %p2762_p1 = pmov %p2759_p3 }
  0xa4   : > { %s1500_s20 = sshll.u32 %s2555_s1, 3  ;;  %p2763_p6 = scmp.ne.s32.totalorder %s2347_s19, 0 }
  0xa5   : > { %2219 = vsyncadd (%p2762_p1), [#allocation11], 4294957056  ;;  %s2574_s9 = scalar_lea.vmem [#allocation13], %s1500_s20  ;;  %s2576_s26 = scalar_lea.vmem [#allocation14], %s1500_s20  ;;  %v2261_v0 = vmov (!%p2763_p6), 0.0  }
  0xa6   : > { %443 = sbr.rel (%p2763_p6) target bundleno = 173 (0xad), region = 72  ;;  %444 = vst [vmem:[#allocation2] sm:$0xff] (!%p2763_p6), %v2261_v0  ;;  %445 = vst [vmem:[#allocation2 + $0x8] sm:$0xff] (!%p2763_p6), %v2261_v0 }
  0xa7   : > { %446 = vst [vmem:[#allocation3] sm:$0xff] (!%p2763_p6), %v2261_v0  ;;  %447 = vst [vmem:[#allocation3 + $0x8] sm:$0xff] (!%p2763_p6), %v2261_v0 }
  0xad PF: > { %v454_v1 = vld [vmem:[#allocation7 + $0x8] sm:$0xff]  ;;  %v453_v3 = vld [vmem:[#allocation7] sm:$0xff]  ;;  %v2262_v8 = vmov 0.0   ;;  %v456_v20 = vld [vmem:[#allocation7 + $0x18] sm:$0xff]  ;;  %vm2264_vm0 = vmmov 0   ;;  %p1510_p8 = scmp.ne.s32.totalorder %s2347_s19, 7 }
  0xae   : > { %v458_v2 = vld [vmem:[#allocation7 + $0x28] sm:$0xff]  ;;  %v457_v5 = vld [vmem:[#allocation7 + $0x20] sm:$0xff]  ;;  %581 = vmatprep.mubr.f32.mxu0 %v2262_v8  ;;  %652 = vmatprep.mubr.f32.mxu1 %v2262_v8  ;;  %v460_v21 = vld [vmem:[#allocation7 + $0x38] sm:$0xff] }
  0xaf   : > { %v1574_v4 = vpack.c.bf16 %v458_v2, %v454_v1  ;;  %v462_v6 = vld [vmem:[#allocation7 + $0x48] sm:$0xff]  ;;  %v1576_v9 = vpack.c.bf16 %v457_v5, %v453_v3  ;;  %v461_v11 = vld [vmem:[#allocation7 + $0x40] sm:$0xff]  ;;  %v1606_v23 = vpack.c.bf16 %v460_v21, %v456_v20  ;;  %v455_v24 = vld [vmem:[#allocation7 + $0x10] sm:$0xff] }
  0xb0   : > { %v466_v7 = vld [vmem:[#allocation7 + $0x68] sm:$0xff]  ;;  %v465_v12 = vld [vmem:[#allocation7 + $0x60] sm:$0xff]  ;;  %v459_v25 = vld [vmem:[#allocation7 + $0x30] sm:$0xff] }
  0xb1   : > { %v1578_v10 = vpack.c.bf16 %v466_v7, %v462_v6  ;;  %v470_v13 = vld [vmem:[#allocation7 + $0x88] sm:$0xff]  ;;  %1575 = vmatprep.subr.bf16.mxu0 %v1574_v4  ;;  %v1580_v15 = vpack.c.bf16 %v465_v12, %v461_v11  ;;  %v469_v16 = vld [vmem:[#allocation7 + $0x80] sm:$0xff]  ;;  %v1608_v26 = vpack.c.bf16 %v459_v25, %v455_v24  ;;  %1607 = vmatprep.subr.bf16.mxu1 %v1606_v23  ;;  %v464_v28 = vld [vmem:[#allocation7 + $0x58] sm:$0xff] }
  0xb2   : > { %v474_v14 = vld [vmem:[#allocation7 + $0xa8] sm:$0xff]  ;;  %1577 = vmatpush1.bf16.msra.mxu0 %v1576_v9  ;;  %v473_v17 = vld [vmem:[#allocation7 + $0xa0] sm:$0xff]  ;;  %v468_v29 = vld [vmem:[#allocation7 + $0x78] sm:$0xff] }
  0xb3   : > { %1579 = vmatprep.subr.bf16.mxu0 %v1578_v10  ;;  %v1582_v18 = vpack.c.bf16 %v474_v14, %v470_v13  ;;  %v478_v19 = vld [vmem:[#allocation7 + $0xc8] sm:$0xff]  ;;  %v1584_v27 = vpack.c.bf16 %v473_v17, %v469_v16  ;;  %v463_v30 = vld [vmem:[#allocation7 + $0x50] sm:$0xff]  ;;  %v477_v32 = vld [vmem:[#allocation7 + $0xc0] sm:$0xff]  ;;  %1609 = vmatpush1.bf16.msra.mxu1 %v1608_v26  ;;  %v1610_v34 = vpack.c.bf16 %v468_v29, %v464_v28 }
  0xb4   : > { %v482_v22 = vld [vmem:[#allocation7 + $0xe8] sm:$0xff]  ;;  %v481_v33 = vld [vmem:[#allocation7 + $0xe0] sm:$0xff]  ;;  %v467_v35 = vld [vmem:[#allocation7 + $0x70] sm:$0xff] }
  0xb5   : > { %v1586_v31 = vpack.c.bf16 %v482_v22, %v478_v19  ;;  %v486_v36 = vld [vmem:[#allocation7 + $0x108] sm:$0xff]  ;;  %v1612_v38 = vpack.c.bf16 %v467_v35, %v463_v30  ;;  %v472_v39 = vld [vmem:[#allocation7 + $0x98] sm:$0xff]  ;;  %1611 = vmatprep.subr.bf16.mxu1 %v1610_v34  ;;  %v471_v41 = vld [vmem:[#allocation7 + $0x90] sm:$0xff]  ;;  %v1588_v43 = vpack.c.bf16 %v481_v33, %v477_v32 }
  0xb6   : > { %1581 = vmatpush1.bf16.msra.mxu0 %v1580_v15  ;;  %v490_v37 = vld [vmem:[#allocation7 + $0x128] sm:$0xff]  ;;  %v476_v40 = vld [vmem:[#allocation7 + $0xb8] sm:$0xff]  ;;  %v475_v42 = vld [vmem:[#allocation7 + $0xb0] sm:$0xff] }
  0xb7   : > { %1583 = vmatprep.subr.bf16.mxu0 %v1582_v18  ;;  %v485_v44 = vld [vmem:[#allocation7 + $0x100] sm:$0xff]  ;;  %v1614_v46 = vpack.c.bf16 %v476_v40, %v472_v39  ;;  %v1590_v47 = vpack.c.bf16 %v490_v37, %v486_v36  ;;  %1613 = vmatpush1.bf16.msra.mxu1 %v1612_v38  ;;  %v494_v48 = vld [vmem:[#allocation7 + $0x148] sm:$0xff]  ;;  %v1616_v49 = vpack.c.bf16 %v475_v42, %v471_v41  ;;  %v480_v50 = vld [vmem:[#allocation7 + $0xd8] sm:$0xff] }
  0xb8   : > { %v489_v45 = vld [vmem:[#allocation7 + $0x120] sm:$0xff]  ;;  %v484_v51 = vld [vmem:[#allocation7 + $0xf8] sm:$0xff]  ;;  %v498_v52 = vld [vmem:[#allocation7 + $0x168] sm:$0xff] }
  0xb9   : > { %1615 = vmatprep.subr.bf16.mxu1 %v1614_v46  ;;  %v1618_v53 = vpack.c.bf16 %v484_v51, %v480_v50  ;;  %v479_v54 = vld [vmem:[#allocation7 + $0xd0] sm:$0xff]  ;;  %v1592_v56 = vpack.c.bf16 %v489_v45, %v485_v44  ;;  %v488_v57 = vld [vmem:[#allocation7 + $0x118] sm:$0xff]  ;;  %v1594_v59 = vpack.c.bf16 %v498_v52, %v494_v48  ;;  %v493_v60 = vld [vmem:[#allocation7 + $0x140] sm:$0xff] }
  0xba   : > { %1585 = vmatpush1.bf16.msra.mxu0 %v1584_v27  ;;  %v483_v55 = vld [vmem:[#allocation7 + $0xf0] sm:$0xff]  ;;  %v492_v58 = vld [vmem:[#allocation7 + $0x138] sm:$0xff]  ;;  %v497_v61 = vld [vmem:[#allocation7 + $0x160] sm:$0xff] }
  0xbb   : > { %1587 = vmatprep.subr.bf16.mxu0 %v1586_v31  ;;  %1617 = vmatpush1.bf16.msra.mxu1 %v1616_v49  ;;  %v502_v62 = vld [vmem:[#allocation7 + $0x188] sm:$0xff]  ;;  %v1620_v63 = vpack.c.bf16 %v483_v55, %v479_v54  ;;  %v1622_v1 = vpack.c.bf16 %v492_v58, %v488_v57  ;;  %v487_v2 = vld [vmem:[#allocation7 + $0x110] sm:$0xff]  ;;  %v496_v4 = vld [vmem:[#allocation7 + $0x158] sm:$0xff]  ;;  %v1596_v6 = vpack.c.bf16 %v497_v61, %v493_v60 }
  0xbc   : > { %v506_v0 = vld [vmem:[#allocation7 + $0x1a8] sm:$0xff]  ;;  %1619 = vmatprep.subr.bf16.mxu1 %v1618_v53  ;;  %v491_v3 = vld [vmem:[#allocation7 + $0x130] sm:$0xff]  ;;  %v500_v5 = vld [vmem:[#allocation7 + $0x178] sm:$0xff] }
  0xbd   : > { %v1598_v7 = vpack.c.bf16 %v506_v0, %v502_v62  ;;  %v501_v9 = vld [vmem:[#allocation7 + $0x180] sm:$0xff]  ;;  %v510_v11 = vld [vmem:[#allocation7 + $0x1c8] sm:$0xff]  ;;  %v1624_v12 = vpack.c.bf16 %v491_v3, %v487_v2  ;;  %v1626_v14 = vpack.c.bf16 %v500_v5, %v496_v4  ;;  %v495_v15 = vld [vmem:[#allocation7 + $0x150] sm:$0xff] }
  0xbe   : > { %1589 = vmatpush1.bf16.msra.mxu0 %v1588_v43  ;;  %v505_v10 = vld [vmem:[#allocation7 + $0x1a0] sm:$0xff]  ;;  %v514_v13 = vld [vmem:[#allocation7 + $0x1e8] sm:$0xff]  ;;  %v499_v16 = vld [vmem:[#allocation7 + $0x170] sm:$0xff] }
  0xbf   : > { %1591 = vmatprep.subr.bf16.mxu0 %v1590_v47  ;;  %1621 = vmatpush1.bf16.msra.mxu1 %v1620_v63  ;;  %v504_v17 = vld [vmem:[#allocation7 + $0x198] sm:$0xff]  ;;  %v1600_v19 = vpack.c.bf16 %v505_v10, %v501_v9  ;;  %v1602_v20 = vpack.c.bf16 %v514_v13, %v510_v11  ;;  %v509_v21 = vld [vmem:[#allocation7 + $0x1c0] sm:$0xff]  ;;  %v1628_v23 = vpack.c.bf16 %v499_v16, %v495_v15  ;;  %v503_v24 = vld [vmem:[#allocation7 + $0x190] sm:$0xff] }
  0xc0   : > { %1623 = vmatprep.subr.bf16.mxu1 %v1622_v1  ;;  %v508_v18 = vld [vmem:[#allocation7 + $0x1b8] sm:$0xff]  ;;  %v513_v22 = vld [vmem:[#allocation7 + $0x1e0] sm:$0xff]  ;;  %v507_v26 = vld [vmem:[#allocation7 + $0x1b0] sm:$0xff] }
  0xc1   : > { %v1630_v25 = vpack.c.bf16 %v508_v18, %v504_v17  ;;  %v755_v27 = vld [vmem:[#allocation10 + $0x8] sm:$0xff]  ;;  %v512_v29 = vld [vmem:[#allocation7 + $0x1d8] sm:$0xff]  ;;  %v1604_v31 = vpack.c.bf16 %v513_v22, %v509_v21  ;;  %v1632_v32 = vpack.c.bf16 %v507_v26, %v503_v24  ;;  %v511_v33 = vld [vmem:[#allocation7 + $0x1d0] sm:$0xff] }
  0xc2   : > { %1593 = vmatpush1.bf16.msra.mxu0 %v1592_v56  ;;  %v759_v28 = vld [vmem:[#allocation10 + $0x28] sm:$0xff]  ;;  %v516_v30 = vld [vmem:[#allocation7 + $0x1f8] sm:$0xff]  ;;  %v754_v35 = vld [vmem:[#allocation10] sm:$0xff] }
  0xc3   : > { %1595 = vmatprep.subr.bf16.mxu0 %v1594_v59  ;;  %1625 = vmatpush1.bf16.msra.mxu1 %v1624_v12  ;;  %v1638_v34 = vpack.c.bf16 %v759_v28, %v755_v27  ;;  %v758_v36 = vld [vmem:[#allocation10 + $0x20] sm:$0xff]  ;;  %v1634_v37 = vpack.c.bf16 %v516_v30, %v512_v29  ;;  %v515_v38 = vld [vmem:[#allocation7 + $0x1f0] sm:$0xff]  ;;  %v763_v39 = vld [vmem:[#allocation10 + $0x48] sm:$0xff] }
  0xc4   : > { %1627 = vmatprep.subr.bf16.mxu1 %v1626_v14  ;;  %v767_v40 = vld [vmem:[#allocation10 + $0x68] sm:$0xff]  ;;  %v757_v41 = vld [vmem:[#allocation10 + $0x18] sm:$0xff]  ;;  %v452_v43 = vld [vmem:[#allocation2] sm:$0xff]  ;;  %v1640_v44 = vpack.c.bf16 %v758_v36, %v754_v35  ;;  %v1636_v45 = vpack.c.bf16 %v515_v38, %v511_v33 }
  0xc5   : > { %v761_v42 = vld [vmem:[#allocation10 + $0x38] sm:$0xff]  ;;  %v756_v46 = vld [vmem:[#allocation10 + $0x10] sm:$0xff]  ;;  %v1642_v47 = vpack.c.bf16 %v767_v40, %v763_v39  ;;  %v762_v48 = vld [vmem:[#allocation10 + $0x40] sm:$0xff] }
  0xc6   : > { %1597 = vmatpush1.bf16.msra.mxu0 %v1596_v6  ;;  %v766_v49 = vld [vmem:[#allocation10 + $0x60] sm:$0xff]  ;;  %v1670_v50 = vpack.c.bf16 %v761_v42, %v757_v41  ;;  %v760_v51 = vld [vmem:[#allocation10 + $0x30] sm:$0xff]  ;;  %v771_v52 = vld [vmem:[#allocation10 + $0x88] sm:$0xff] }
  0xc7   : > { %1599 = vmatprep.subr.bf16.mxu0 %v1598_v7  ;;  %1629 = vmatpush1.bf16.msra.mxu1 %v1628_v23  ;;  %v775_v53 = vld [vmem:[#allocation10 + $0xa8] sm:$0xff]  ;;  %v765_v54 = vld [vmem:[#allocation10 + $0x58] sm:$0xff]  ;;  %v1644_v56 = vpack.c.bf16 %v766_v49, %v762_v48  ;;  %v1672_v57 = vpack.c.bf16 %v760_v51, %v756_v46  ;;  %v764_v58 = vld [vmem:[#allocation10 + $0x50] sm:$0xff] }
  0xc8   : > { %1631 = vmatprep.subr.bf16.mxu1 %v1630_v25  ;;  %v769_v55 = vld [vmem:[#allocation10 + $0x78] sm:$0xff]  ;;  %v1646_v59 = vpack.c.bf16 %v775_v53, %v771_v52  ;;  %v770_v60 = vld [vmem:[#allocation10 + $0x80] sm:$0xff]  ;;  %v768_v63 = vld [vmem:[#allocation10 + $0x70] sm:$0xff] }
  0xc9   : > { %v774_v61 = vld [vmem:[#allocation10 + $0xa0] sm:$0xff]  ;;  %v1674_v62 = vpack.c.bf16 %v769_v55, %v765_v54  ;;  %v779_v0 = vld [vmem:[#allocation10 + $0xc8] sm:$0xff]  ;;  %v773_v2 = vld [vmem:[#allocation10 + $0x98] sm:$0xff]  ;;  %v1676_v5 = vpack.c.bf16 %v768_v63, %v764_v58 }
  0xca   : > { %1601 = vmatpush1.bf16.msra.mxu0 %v1600_v19  ;;  %v783_v1 = vld [vmem:[#allocation10 + $0xe8] sm:$0xff]  ;;  %v777_v3 = vld [vmem:[#allocation10 + $0xb8] sm:$0xff]  ;;  %v1648_v4 = vpack.c.bf16 %v774_v61, %v770_v60  ;;  %v772_v6 = vld [vmem:[#allocation10 + $0x90] sm:$0xff] }
  0xcb   : > { %1603 = vmatprep.subr.bf16.mxu0 %v1602_v20  ;;  %1633 = vmatpush1.bf16.msra.mxu1 %v1632_v32  ;;  %v1650_v7 = vpack.c.bf16 %v783_v1, %v779_v0  ;;  %v778_v9 = vld [vmem:[#allocation10 + $0xc0] sm:$0xff]  ;;  %v1678_v11 = vpack.c.bf16 %v777_v3, %v773_v2  ;;  %v776_v12 = vld [vmem:[#allocation10 + $0xb0] sm:$0xff]  ;;  %v787_v13 = vld [vmem:[#allocation10 + $0x108] sm:$0xff] }
  0xcc   : > { %1635 = vmatprep.subr.bf16.mxu1 %v1634_v37  ;;  %v782_v10 = vld [vmem:[#allocation10 + $0xe0] sm:$0xff]  ;;  %v791_v14 = vld [vmem:[#allocation10 + $0x128] sm:$0xff]  ;;  %v781_v15 = vld [vmem:[#allocation10 + $0xd8] sm:$0xff]  ;;  %v1680_v18 = vpack.c.bf16 %v776_v12, %v772_v6 }
  0xcd   : > { %v785_v16 = vld [vmem:[#allocation10 + $0xf8] sm:$0xff]  ;;  %v1652_v17 = vpack.c.bf16 %v782_v10, %v778_v9  ;;  %v1654_v19 = vpack.c.bf16 %v791_v14, %v787_v13  ;;  %v780_v21 = vld [vmem:[#allocation10 + $0xd0] sm:$0xff]  ;;  %v786_v27 = vld [vmem:[#allocation10 + $0x100] sm:$0xff] }
  0xce   : > { %1605 = vmatpush1.bf16.msra.mxu0 %v1604_v31  ;;  %v1682_v20 = vpack.c.bf16 %v785_v16, %v781_v15  ;;  %v784_v22 = vld [vmem:[#allocation10 + $0xf0] sm:$0xff]  ;;  %v789_v23 = vld [vmem:[#allocation10 + $0x118] sm:$0xff]  ;;  %v790_v28 = vld [vmem:[#allocation10 + $0x120] sm:$0xff] }
  0xcf   : > { %1639 = vmatprep.subr.bf16.mxu0 %v1638_v34  ;;  %1637 = vmatpush1.bf16.msra.mxu1 %v1636_v45  ;;  %v793_v24 = vld [vmem:[#allocation10 + $0x138] sm:$0xff]  ;;  %v1684_v25 = vpack.c.bf16 %v784_v22, %v780_v21  ;;  %v788_v29 = vld [vmem:[#allocation10 + $0x110] sm:$0xff]  ;;  %v1656_v30 = vpack.c.bf16 %v790_v28, %v786_v27  ;;  %v795_v33 = vld [vmem:[#allocation10 + $0x148] sm:$0xff] }
  0xd0   : > { %1671 = vmatprep.subr.bf16.mxu1 %v1670_v50  ;;  %v1686_v26 = vpack.c.bf16 %v793_v24, %v789_v23  ;;  %v792_v31 = vld [vmem:[#allocation10 + $0x130] sm:$0xff]  ;;  %v799_v34 = vld [vmem:[#allocation10 + $0x168] sm:$0xff]  ;;  %v797_v35 = vld [vmem:[#allocation10 + $0x158] sm:$0xff] }
  0xd1   : > { %582 = vmatmul.mubr.f32.vlgmr.msra.gmra.mrb[0].mxu0 %v452_v43  ;;  %v1688_v32 = vpack.c.bf16 %v792_v31, %v788_v29  ;;  %v1658_v36 = vpack.c.bf16 %v799_v34, %v795_v33  ;;  %v801_v37 = vld [vmem:[#allocation10 + $0x178] sm:$0xff]  ;;  %v794_v38 = vld [vmem:[#allocation10 + $0x140] sm:$0xff]  ;;  %v796_v41 = vld [vmem:[#allocation10 + $0x150] sm:$0xff] }
  0xd2   : > { %1641 = vmatpush1.bf16.msra.mxu0 %v1640_v44  ;;  %882 = vmatprep.mubr.f32.mxu0 %v2262_v8  ;;  %v1690_v39 = vpack.c.bf16 %v801_v37, %v797_v35  ;;  %v798_v40 = vld [vmem:[#allocation10 + $0x160] sm:$0xff]  ;;  %v800_v42 = vld [vmem:[#allocation10 + $0x170] sm:$0xff]  ;;  %v803_v45 = vld [vmem:[#allocation10 + $0x188] sm:$0xff] }
  0xd3   : > { %1643 = vmatprep.subr.bf16.mxu0 %v1642_v47  ;;  %653 = vmatmul.mubr.f32.vlgmr.msra.gmra.mrb[0].mxu1 %v452_v43  ;;  %v1660_v43 = vpack.c.bf16 %v798_v40, %v794_v38  ;;  %v1692_v44 = vpack.c.bf16 %v800_v42, %v796_v41  ;;  %v807_v46 = vld [vmem:[#allocation10 + $0x1a8] sm:$0xff]  ;;  %v805_v47 = vld [vmem:[#allocation10 + $0x198] sm:$0xff]  ;;  %v802_v50 = vld [vmem:[#allocation10 + $0x180] sm:$0xff] }
  0xd4   : > { %1673 = vmatpush1.bf16.msra.mxu1 %v1672_v57  ;;  %953 = vmatprep.mubr.f32.mxu1 %v2262_v8  ;;  %v1662_v48 = vpack.c.bf16 %v807_v46, %v803_v45  ;;  %v809_v49 = vld [vmem:[#allocation10 + $0x1b8] sm:$0xff]  ;;  %v806_v51 = vld [vmem:[#allocation10 + $0x1a0] sm:$0xff]  ;;  %v804_v54 = vld [vmem:[#allocation10 + $0x190] sm:$0xff] }
  0xd5   : > { %1675 = vmatprep.subr.bf16.mxu1 %v1674_v62  ;;  %v1694_v52 = vpack.c.bf16 %v809_v49, %v805_v47  ;;  %v1664_v53 = vpack.c.bf16 %v806_v51, %v802_v50  ;;  %v808_v55 = vld [vmem:[#allocation10 + $0x1b0] sm:$0xff]  ;;  %v811_v57 = vld [vmem:[#allocation10 + $0x1c8] sm:$0xff]  ;;  %v817_v61 = vld [vmem:[#allocation10 + $0x1f8] sm:$0xff] }
  0xd6   : > { %1645 = vmatpush1.bf16.msra.mxu0 %v1644_v56  ;;  %v1696_v56 = vpack.c.bf16 %v808_v55, %v804_v54  ;;  %v815_v58 = vld [vmem:[#allocation10 + $0x1e8] sm:$0xff]  ;;  %v810_v62 = vld [vmem:[#allocation10 + $0x1c0] sm:$0xff]  ;;  %v812_v2 = vld [vmem:[#allocation10 + $0x1d0] sm:$0xff] }
  0xd7   : > { %1647 = vmatprep.subr.bf16.mxu0 %v1646_v59  ;;  %v813_v59 = vld [vmem:[#allocation10 + $0x1d8] sm:$0xff]  ;;  %v1666_v60 = vpack.c.bf16 %v815_v58, %v811_v57  ;;  %v814_v63 = vld [vmem:[#allocation10 + $0x1e0] sm:$0xff]  ;;  %v816_v3 = vld [vmem:[#allocation10 + $0x1f0] sm:$0xff] }
  0xd8   : > { %1677 = vmatpush1.bf16.msra.mxu1 %v1676_v5  ;;  %v1698_v0 = vpack.c.bf16 %v817_v61, %v813_v59  ;;  %v1668_v1 = vpack.c.bf16 %v814_v63, %v810_v62  ;;  %v689_v5 = vld [vmem:[#allocation9 + $0x8] sm:$0xff]  ;;  %v695_v10 = vld [vmem:[#allocation9 + $0x38] sm:$0xff]  ;;  %v692_v12 = vld [vmem:[#allocation9 + $0x20] sm:$0xff] }
  0xd9   : > { %1679 = vmatprep.subr.bf16.mxu1 %v1678_v11  ;;  %v693_v6 = vld [vmem:[#allocation9 + $0x28] sm:$0xff]  ;;  %v688_v11 = vld [vmem:[#allocation9] sm:$0xff]  ;;  %v690_v15 = vld [vmem:[#allocation9 + $0x10] sm:$0xff] }
  0xda   : > { %1649 = vmatpush1.bf16.msra.mxu0 %v1648_v4  ;;  %v1700_v4 = vpack.c.bf16 %v816_v3, %v812_v2  ;;  %v1702_v9 = vpack.c.bf16 %v693_v6, %v689_v5  ;;  %v1704_v14 = vpack.c.bf16 %v692_v12, %v688_v11  ;;  %v694_v16 = vld [vmem:[#allocation9 + $0x30] sm:$0xff]  ;;  %v699_v21 = vld [vmem:[#allocation9 + $0x58] sm:$0xff]  ;;  %v696_v24 = vld [vmem:[#allocation9 + $0x40] sm:$0xff] }
  0xdb   : > { %1651 = vmatprep.subr.bf16.mxu0 %v1650_v7  ;;  %v691_v7 = vld [vmem:[#allocation9 + $0x18] sm:$0xff]  ;;  %v698_v28 = vld [vmem:[#allocation9 + $0x50] sm:$0xff]  ;;  %v705_v31 = vld [vmem:[#allocation9 + $0x88] sm:$0xff] }
  0xdc   : > { %1681 = vmatpush1.bf16.msra.mxu1 %v1680_v18  ;;  %v1734_v13 = vpack.c.bf16 %v695_v10, %v691_v7  ;;  %v1736_v18 = vpack.c.bf16 %v694_v16, %v690_v15  ;;  %v703_v23 = vld [vmem:[#allocation9 + $0x78] sm:$0xff]  ;;  %v702_v29 = vld [vmem:[#allocation9 + $0x70] sm:$0xff]  ;;  %v708_v37 = vld [vmem:[#allocation9 + $0xa0] sm:$0xff] }
  0xdd   : > { %1683 = vmatprep.subr.bf16.mxu1 %v1682_v20  ;;  %v701_v20 = vld [vmem:[#allocation9 + $0x68] sm:$0xff]  ;;  %v707_v33 = vld [vmem:[#allocation9 + $0x98] sm:$0xff]  ;;  %v706_v40 = vld [vmem:[#allocation9 + $0x90] sm:$0xff] }
  0xde   : > { %1653 = vmatpush1.bf16.msra.mxu0 %v1652_v17  ;;  %v753_v17 = vld [vmem:[#allocation2 + $0x8] sm:$0xff]  ;;  %v711_v35 = vld [vmem:[#allocation9 + $0xb8] sm:$0xff]  ;;  %v710_v41 = vld [vmem:[#allocation9 + $0xb0] sm:$0xff] }
  0xdf   : > { %1655 = vmatprep.subr.bf16.mxu0 %v1654_v19  ;;  %v697_v19 = vld [vmem:[#allocation9 + $0x48] sm:$0xff]  ;;  %v1742_v38 = vpack.c.bf16 %v711_v35, %v707_v33  ;;  %v1744_v42 = vpack.c.bf16 %v710_v41, %v706_v40  ;;  %v715_v45 = vld [vmem:[#allocation9 + $0xd8] sm:$0xff]  ;;  %v716_v49 = vld [vmem:[#allocation9 + $0xe0] sm:$0xff] }
  0xe0   : > { %1685 = vmatpush1.bf16.msra.mxu1 %v1684_v25  ;;  %v1706_v22 = vpack.c.bf16 %v701_v20, %v697_v19  ;;  %v700_v25 = vld [vmem:[#allocation9 + $0x60] sm:$0xff]  ;;  %v719_v47 = vld [vmem:[#allocation9 + $0xf8] sm:$0xff]  ;;  %v721_v55 = vld [vmem:[#allocation9 + $0x108] sm:$0xff] }
  0xe1   : > { %1687 = vmatprep.subr.bf16.mxu1 %v1686_v26  ;;  %v1738_v26 = vpack.c.bf16 %v703_v23, %v699_v21  ;;  %v1708_v27 = vpack.c.bf16 %v700_v25, %v696_v24  ;;  %v1746_v50 = vpack.c.bf16 %v719_v47, %v715_v45  ;;  %v723_v57 = vld [vmem:[#allocation9 + $0x118] sm:$0xff]  ;;  %v724_v61 = vld [vmem:[#allocation9 + $0x120] sm:$0xff]  ;;  %v729_v3 = vld [vmem:[#allocation9 + $0x148] sm:$0xff] }
  0xe2   : > { %1657 = vmatpush1.bf16.msra.mxu0 %v1656_v30  ;;  %v1740_v30 = vpack.c.bf16 %v702_v29, %v698_v28  ;;  %v727_v59 = vld [vmem:[#allocation9 + $0x138] sm:$0xff]  ;;  %v732_v10 = vld [vmem:[#allocation9 + $0x160] sm:$0xff]  ;;  %v737_v15 = vld [vmem:[#allocation9 + $0x188] sm:$0xff] }
  0xe3   : > { %1659 = vmatprep.subr.bf16.mxu0 %v1658_v36  ;;  %v704_v36 = vld [vmem:[#allocation9 + $0x80] sm:$0xff]  ;;  %v1750_v62 = vpack.c.bf16 %v727_v59, %v723_v57  ;;  %v731_v5 = vld [vmem:[#allocation9 + $0x158] sm:$0xff]  ;;  %v738_v24 = vld [vmem:[#allocation9 + $0x190] sm:$0xff] }
  0xe4   : > { %1689 = vmatpush1.bf16.msra.mxu1 %v1688_v32  ;;  %v709_v32 = vld [vmem:[#allocation9 + $0xa8] sm:$0xff]  ;;  %v735_v7 = vld [vmem:[#allocation9 + $0x178] sm:$0xff]  ;;  %v740_v23 = vld [vmem:[#allocation9 + $0x1a0] sm:$0xff] }
  0xe5   : > { %1691 = vmatprep.subr.bf16.mxu1 %v1690_v39  ;;  %v1710_v34 = vpack.c.bf16 %v709_v32, %v705_v31  ;;  %v1712_v39 = vpack.c.bf16 %v708_v37, %v704_v36  ;;  %v1754_v11 = vpack.c.bf16 %v735_v7, %v731_v5  ;;  %v743_v19 = vld [vmem:[#allocation9 + $0x1b8] sm:$0xff]  ;;  %v749_v28 = vld [vmem:[#allocation9 + $0x1e8] sm:$0xff]  ;;  %v744_v33 = vld [vmem:[#allocation9 + $0x1c0] sm:$0xff] }
  0xe6   : > { %1661 = vmatpush1.bf16.msra.mxu0 %v1660_v43  ;;  %v713_v43 = vld [vmem:[#allocation9 + $0xc8] sm:$0xff]  ;;  %v747_v31 = vld [vmem:[#allocation9 + $0x1d8] sm:$0xff]  ;;  %v748_v35 = vld [vmem:[#allocation9 + $0x1e0] sm:$0xff] }
  0xe7   : > { %1663 = vmatprep.subr.bf16.mxu0 %v1662_v48  ;;  %v712_v48 = vld [vmem:[#allocation9 + $0xc0] sm:$0xff]  ;;  %v751_v32 = vld [vmem:[#allocation9 + $0x1f8] sm:$0xff]  ;;  %v746_v36 = vld [vmem:[#allocation9 + $0x1d0] sm:$0xff] }
  0xe8   : > { %1693 = vmatpush1.bf16.msra.mxu1 %v1692_v44  ;;  %v717_v44 = vld [vmem:[#allocation9 + $0xe8] sm:$0xff]  ;;  %v1716_v51 = vpack.c.bf16 %v716_v49, %v712_v48  ;;  %v750_v37 = vld [vmem:[#allocation9 + $0x1f0] sm:$0xff]  ;;  %v448_v40 = vld [vmem:[%s2559_s11] sm:$0xff] }
  0xe9   : > { %1695 = vmatprep.subr.bf16.mxu1 %v1694_v52  ;;  %v1714_v46 = vpack.c.bf16 %v717_v44, %v713_v43  ;;  %v714_v52 = vld [vmem:[#allocation9 + $0xd0] sm:$0xff]  ;;  %v449_v41 = vld [vmem:[%s2559_s11 + $0x8] sm:$0xff]  ;;  %v451_v48 = vld [vmem:[%s2559_s11 + $0x18] sm:$0xff] }
  0xea   : > { %1665 = vmatpush1.bf16.msra.mxu0 %v1664_v53  ;;  %v718_v53 = vld [vmem:[#allocation9 + $0xf0] sm:$0xff]  ;;  %v1159_v7 = vld [vmem:[#allocation12] sm:$0xff] }
  0xeb   : > { %1667 = vmatprep.subr.bf16.mxu0 %v1666_v60  ;;  %v1748_v54 = vpack.c.bf16 %v718_v53, %v714_v52  ;;  %v720_v60 = vld [vmem:[#allocation9 + $0x100] sm:$0xff]  ;;  %v450_v52 = vld [vmem:[%s2559_s11 + $0x10] sm:$0xff] }
  0xec   : > { %1697 = vmatpush1.bf16.msra.mxu1 %v1696_v56  ;;  %v725_v56 = vld [vmem:[#allocation9 + $0x128] sm:$0xff]  ;;  %v1720_v63 = vpack.c.bf16 %v724_v61, %v720_v60  ;;  %v663_v61 = vld [vmem:[#allocation3] sm:$0xff] }
  0xed   : > { %1699 = vmatprep.subr.bf16.mxu1 %v1698_v0  ;;  %v1718_v58 = vpack.c.bf16 %v725_v56, %v721_v55  ;;  %v722_v0 = vld [vmem:[#allocation9 + $0x110] sm:$0xff] }
  0xee   : > { %1669 = vmatpush1.bf16.msra.mxu0 %v1668_v1  ;;  %v726_v1 = vld [vmem:[#allocation9 + $0x130] sm:$0xff] }
  0xef   : > { %1703 = vmatprep.subr.bf16.mxu0 %v1702_v9  ;;  %v1752_v2 = vpack.c.bf16 %v726_v1, %v722_v0  ;;  %v728_v9 = vld [vmem:[#allocation9 + $0x140] sm:$0xff] }
  0xf0   : > { %1701 = vmatpush1.bf16.msra.mxu1 %v1700_v4  ;;  %v733_v4 = vld [vmem:[#allocation9 + $0x168] sm:$0xff]  ;;  %v1724_v12 = vpack.c.bf16 %v732_v10, %v728_v9 }
  0xf1   : > { %1735 = vmatprep.subr.bf16.mxu1 %v1734_v13  ;;  %883 = vmatmul.mubr.f32.vlgmr.msra.gmra.mrb[2].mxu0 %v753_v17  ;;  %v1722_v6 = vpack.c.bf16 %v733_v4, %v729_v3  ;;  %v730_v13 = vld [vmem:[#allocation9 + $0x150] sm:$0xff]  ;;  %v1160_v9 = vld [vmem:[#allocation12 + $0x8] sm:$0xff] }
  0xf2   : > { %1705 = vmatpush1.bf16.msra.mxu0 %v1704_v14  ;;  %1024 = vmatprep.mubr.f32.mxu0 %v2262_v8  ;;  %v734_v14 = vld [vmem:[#allocation9 + $0x170] sm:$0xff]  ;;  %v1767_v10 = vpack.c.bf16 %v1160_v9, %v1159_v7 }
  0xf3   : > { %954 = vmatmul.mubr.f32.vlgmr.msra.gmra.mrb[2].mxu1 %v753_v17  ;;  %1707 = vmatprep.subr.bf16.mxu0 %v1706_v22  ;;  %v1756_v16 = vpack.c.bf16 %v734_v14, %v730_v13  ;;  %v741_v17 = vld [vmem:[#allocation9 + $0x1a8] sm:$0xff]  ;;  %v736_v22 = vld [vmem:[#allocation9 + $0x180] sm:$0xff]  ;;  %v1162_v13 = vld [vmem:[#allocation12 + $0x18] sm:$0xff] }
  0xf4   : > { %1737 = vmatpush1.bf16.msra.mxu1 %v1736_v18  ;;  %1095 = vmatprep.mubr.f32.mxu1 %v2262_v8  ;;  %v739_v18 = vld [vmem:[#allocation9 + $0x198] sm:$0xff]  ;;  %v1726_v20 = vpack.c.bf16 %v741_v17, %v737_v15  ;;  %v1728_v25 = vpack.c.bf16 %v740_v23, %v736_v22  ;;  %v1163_v15 = vld [vmem:[#allocation12 + $0x20] sm:$0xff]  ;;  %v1168_v22 = vld [vmem:[#allocation12 + $0x48] sm:$0xff] }
  0xf5   : > { %1739 = vmatprep.subr.bf16.mxu1 %v1738_v26  ;;  %v1758_v21 = vpack.c.bf16 %v743_v19, %v739_v18  ;;  %v742_v26 = vld [vmem:[#allocation9 + $0x1b0] sm:$0xff]  ;;  %v1166_v19 = vld [vmem:[#allocation12 + $0x38] sm:$0xff] }
  0xf6   : > { %1709 = vmatpush1.bf16.msra.mxu0 %v1708_v27  ;;  %v745_v27 = vld [vmem:[#allocation9 + $0x1c8] sm:$0xff]  ;;  %v1760_v29 = vpack.c.bf16 %v742_v26, %v738_v24  ;;  %v1165_v18 = vld [vmem:[#allocation12 + $0x30] sm:$0xff]  ;;  %v1171_v26 = vld [vmem:[#allocation12 + $0x60] sm:$0xff] }
  0xf7   : > { %1711 = vmatprep.subr.bf16.mxu0 %v1710_v34  ;;  %v1762_v34 = vpack.c.bf16 %v751_v32, %v747_v31  ;;  %v1169_v24 = vld [vmem:[#allocation12 + $0x50] sm:$0xff]  ;;  %v1174_v31 = vld [vmem:[#allocation12 + $0x78] sm:$0xff] }
  0xf8   : > { %1741 = vmatpush1.bf16.msra.mxu1 %v1740_v30  ;;  %v1730_v30 = vpack.c.bf16 %v749_v28, %v745_v27  ;;  %v1172_v28 = vld [vmem:[#allocation12 + $0x68] sm:$0xff] }
  0xf9   : > { %1743 = vmatprep.subr.bf16.mxu1 %v1742_v38  ;;  %v1732_v38 = vpack.c.bf16 %v748_v35, %v744_v33  ;;  %v1104_v33 = vlaneseq }
  0xfa   : > { %1713 = vmatpush1.bf16.msra.mxu0 %v1712_v39  ;;  %v1764_v39 = vpack.c.bf16 %v750_v37, %v746_v36  ;;  %v1102_v36 = vld [vmem:[%s2731_s4] sm:$0xf] }
  0xfb   : > { %1715 = vmatprep.subr.bf16.mxu0 %v1714_v46 }
  0xfc   : > { %1745 = vmatpush1.bf16.msra.mxu1 %v1744_v42 }
  0xfd   : > { %1747 = vmatprep.subr.bf16.mxu1 %v1746_v50 }
  0xfe   : > { %1717 = vmatpush1.bf16.msra.mxu0 %v1716_v51 }
  0xff   : > { %1719 = vmatprep.subr.bf16.mxu0 %v1718_v58 }
 0x100   : > { %1749 = vmatpush1.bf16.msra.mxu1 %v1748_v54 }
 0x101   : > { %1751 = vmatprep.subr.bf16.mxu1 %v1750_v62 }
 0x102   : > { %1721 = vmatpush1.bf16.msra.mxu0 %v1720_v63 }
 0x103   : > { %1723 = vmatprep.subr.bf16.mxu0 %v1722_v6 }
 0x104   : > { %1753 = vmatpush1.bf16.msra.mxu1 %v1752_v2 }
 0x105   : > { %1755 = vmatprep.subr.bf16.mxu1 %v1754_v11  ;;  %v2263_v11 = vmov 0.0|0.0  }
 0x106   : > { %1725 = vmatpush1.bf16.msra.mxu0 %v1724_v12  ;;  %v1161_v12 = vld [vmem:[#allocation12 + $0x10] sm:$0xff] }
 0x107   : > { %1727 = vmatprep.subr.bf16.mxu0 %v1726_v20  ;;  %v1770_v14 = vpack.c.bf16 %v1162_v13, %v1161_v12  ;;  %v1776_v20 = vpack.c.bf16 %v1166_v19, %v1165_v18 }
 0x108   : > { %1757 = vmatpush1.bf16.msra.mxu1 %v1756_v16  ;;  %v1164_v16 = vld [vmem:[#allocation12 + $0x28] sm:$0xff] }
 0x109   : > { %1759 = vmatprep.subr.bf16.mxu1 %v1758_v21  ;;  %v1773_v17 = vpack.c.bf16 %v1164_v16, %v1163_v15  ;;  %v1167_v21 = vld [vmem:[#allocation12 + $0x40] sm:$0xff] }
 0x10a   : > { %1729 = vmatpush1.bf16.msra.mxu0 %v1728_v25  ;;  %v1779_v23 = vpack.c.bf16 %v1168_v22, %v1167_v21  ;;  %v1170_v25 = vld [vmem:[#allocation12 + $0x58] sm:$0xff] }
 0x10b   : > { %1731 = vmatprep.subr.bf16.mxu0 %v1730_v30  ;;  %v1782_v27 = vpack.c.bf16 %v1170_v25, %v1169_v24  ;;  %v1173_v30 = vld [vmem:[#allocation12 + $0x70] sm:$0xff] }
 0x10c   : > { %1761 = vmatpush1.bf16.msra.mxu1 %v1760_v29  ;;  %v1785_v29 = vpack.c.bf16 %v1172_v28, %v1171_v26  ;;  %v1788_v32 = vpack.c.bf16 %v1174_v31, %v1173_v30 }
 0x10d   : > { %1763 = vmatprep.subr.bf16.mxu1 %v1762_v34  ;;  %v1105_v34 = vshrl.u32 %v1104_v33, 7 }
 0x10e   : > { %1733 = vmatpush1.bf16.msra.mxu0 %v1732_v38 }
 0x10f   : > { %1766 = vmatprep.subr.bf16.mxu0 %v2263_v11  ;;  %v1106_v35 = vsub.s32 0, %v1105_v34  ;;  %v1110_v37 = vsub.s32 1, %v1105_v34 }
 0x110   : > { %1765 = vmatpush1.bf16.msra.mxu1 %v1764_v39 }
 0x111   : > { %v1107_v38 = vrot.slane %v1102_v36, %v1106_v35  ;;  %v1111_v39 = vrot.slane %v1102_v36, %v1110_v37 }
 0x1a4   : > { %v583_v42 = vpop.f32.mrb[0].mxu0 }
 0x1a5   : > { %v659_v43 = vadd.f32 %v583_v42, %v448_v40  ;;  %v585_v44 = vpop.f32.mrb[1].mxu0 }
 0x1a6   : > { %v660_v45 = vadd.f32 %v585_v44, %v449_v41  ;;  %v654_v49 = vpop.f32.mrb[0].mxu1  ;;  %v1118_v41 = vsub.s32 3, %v1105_v34 }
 0x1a7   : > { %v1503_v46 = vmul.f32 -1.442695, %v659_v43  ;;  %v656_v50 = vpop.f32.mrb[1].mxu1  ;;  %v661_v54 = vadd.f32 %v654_v49, %v450_v52  ;;  %v1114_v49 = vsub.s32 2, %v1105_v34 }
 0x1a8   : > { %v1504_v47 = vmul.f32 -1.442695, %v660_v45  ;;  %v662_v51 = vadd.f32 %v656_v50, %v451_v48  ;;  %v1119_v48 = vrot.slane %v1102_v36, %v1118_v41 }
 0x1a9   : > { %1910 = vpow2.f32 %v1503_v46 }
 0x1aa   : > { %1912 = vpow2.f32 %v1504_v47  ;;  %v1505_v53 = vmul.f32 -1.442695, %v662_v51  ;;  %v1115_v51 = vrot.slane %v1102_v36, %v1114_v49 }
 0x1ac   : > { %1914 = vpow2.f32 %v1505_v53 }
 0x1ad   : > { %1916 = vtanh.f32 %v661_v54 }
 0x1b3   : > { %v1911_v55 = vpop.eup %1910 }
 0x1b4   : > { %v1913_v56 = vpop.eup %1912  ;;  %v667_v57 = vadd.f32 1.0, %v1911_v55 }
 0x1b5   : > { %v673_v58 = vadd.f32 1.0, %v1913_v56 }
 0x1b6   : > { %1918 = vrcp.f32 %v667_v57  ;;  %v1915_v59 = vpop.eup %1914 }
 0x1b7   : > { %1920 = vrcp.f32 %v673_v58  ;;  %v1917_v60 = vpop.eup %1916  ;;  %v680_v63 = vadd.f32 1.0, %v1915_v59 }
 0x1b9   : > { %1922 = vrcp.f32 %v680_v63 }
 0x1c0   : > { %v1919_v62 = vpop.eup %1918 }
 0x1c1   : > { %v1921_v0 = vpop.eup %1920  ;;  %v684_v1 = vmul.f32 %v1919_v62, %v1917_v60  ;;  %v1129_v60 = vld [vmem:[#allocation3 + $0x8] sm:$0xff] }
 0x1c2   : > { %v683_v2 = vmul.f32 %v1921_v0, %v663_v61 }
 0x1c3   : > { %v1923_v4 = vpop.eup %1922 }
 0x1c4   : > { %v685_v3 = vadd.f32 %v684_v1, %v683_v2 }
 0x1c6   : > { %1924 = vtanh.f32 %v685_v3  ;;  %1155 = vst [vmem:[#allocation3] sm:$0xff] %v685_v3 }
 0x1cd   : > { %v1261_v13 = vld [vmem:[#allocation3] sm:$0xff] (!%p1510_p8) }
 0x1ce   : > { %1263 = vst [vmem:[#allocation17] sm:$0xff] (!%p1510_p8), %v1261_v13 }
 0x1d0   : > { %v1925_v5 = vpop.eup %1924 }
 0x1d1   : > { %v687_v6 = vmul.f32 %v1925_v5, %v1923_v4 }
 0x1d3   : > { %1025 = vmatmul.mubr.f32.vlgmr.msra.gmra.mrb[2].mxu0 %v687_v6  ;;  %1154 = vst [vmem:[#allocation2] sm:$0xff] %v687_v6  ;;  %1096 = vmatmul.mubr.f32.vlgmr.msra.gmra.mrb[2].mxu1 %v687_v6  ;;  %v1509_v6 = vld [vmem:[%s2733_s6] ss:$0 sm:$0xff] }
 0x1d4   : > { %1768 = vmatpush3.bf16.msra.mxu0 %v1767_v10  ;;  %1571 = vmatprep.mubr.msk.f32.mxu0 %vm2264_vm0, %v2262_v8 }
 0x1d5   : > { %1769 = vmatprep.subr.bf16.mxu0 %v2263_v11 }
 0x1d8   : > { %1771 = vmatpush3.bf16.msra.mxu0 %v1770_v14 }
 0x1d9   : > { %1772 = vmatprep.subr.bf16.mxu0 %v2263_v11 }
 0x1dc   : > { %1774 = vmatpush3.bf16.msra.mxu0 %v1773_v17 }
 0x1dd   : > { %1775 = vmatprep.subr.bf16.mxu0 %v2263_v11 }
 0x1e0   : > { %1777 = vmatpush3.bf16.msra.mxu0 %v1776_v20 }
 0x1e1   : > { %1778 = vmatprep.subr.bf16.mxu0 %v2263_v11 }
 0x1e4   : > { %1780 = vmatpush3.bf16.msra.mxu0 %v1779_v23 }
 0x1e5   : > { %1781 = vmatprep.subr.bf16.mxu0 %v2263_v11 }
 0x1e8   : > { %1783 = vmatpush3.bf16.msra.mxu0 %v1782_v27 }
 0x1e9   : > { %1784 = vmatprep.subr.bf16.mxu0 %v2263_v11 }
 0x1ec   : > { %1786 = vmatpush3.bf16.msra.mxu0 %v1785_v29 }
 0x1ed   : > { %1787 = vmatprep.subr.bf16.mxu0 %v2263_v11  ;;  %v1257_v11 = vld [vmem:[#allocation2] sm:$0xff] (!%p1510_p8) }
 0x1ee   : > { %1259 = vst [vmem:[#allocation16] sm:$0xff] (!%p1510_p8), %v1257_v11 }
 0x1f0   : > { %1789 = vmatpush3.bf16.msra.mxu0 %v1788_v32 }
 0x2a6   : > { %v1026_v8 = vpop.f32.mrb[2].mxu0  ;;  %v1097_v40 = vpop.f32.mrb[2].mxu1 }
 0x2a7   : > { %v1124_v42 = vadd.f32 %v1107_v38, %v1026_v8  ;;  %v1028_v43 = vpop.f32.mrb[3].mxu0  ;;  %v1099_v44 = vpop.f32.mrb[3].mxu1  ;;  %v1126_v53 = vadd.f32 %v1115_v51, %v1097_v40 }
 0x2a8   : > { %v1125_v45 = vadd.f32 %v1111_v39, %v1028_v43  ;;  %v1127_v50 = vadd.f32 %v1119_v48, %v1099_v44 }
 0x2a9   : > { %v1506_v46 = vmul.f32 -1.442695, %v1124_v42 }
 0x2aa   : > { %v1507_v47 = vmul.f32 -1.442695, %v1125_v45  ;;  %v1508_v52 = vmul.f32 -1.442695, %v1127_v50 }
 0x2ab   : > { %1926 = vpow2.f32 %v1506_v46 }
 0x2ac   : > { %1928 = vpow2.f32 %v1507_v47 }
 0x2ad   : > { %1930 = vpow2.f32 %v1508_v52 }
 0x2ae   : > { %1932 = vtanh.f32 %v1126_v53 }
 0x2b5   : > { %v1927_v54 = vpop.eup %1926 }
 0x2b6   : > { %v1929_v55 = vpop.eup %1928  ;;  %v1133_v56 = vadd.f32 1.0, %v1927_v54 }
 0x2b7   : > { %v1139_v57 = vadd.f32 1.0, %v1929_v55  ;;  %v1931_v58 = vpop.eup %1930 }
 0x2b8   : > { %1934 = vrcp.f32 %v1133_v56  ;;  %v1933_v59 = vpop.eup %1932  ;;  %v1146_v0 = vadd.f32 1.0, %v1931_v58 }
 0x2b9   : > { %1936 = vrcp.f32 %v1139_v57 }
 0x2ba   : > { %1938 = vrcp.f32 %v1146_v0 }
 0x2c2   : > { %v1935_v61 = vpop.eup %1934 }
 0x2c3   : > { %v1937_v62 = vpop.eup %1936  ;;  %v1150_v63 = vmul.f32 %v1935_v61, %v1933_v59 }
 0x2c4   : > { %v1149_v1 = vmul.f32 %v1937_v62, %v1129_v60  ;;  %v1939_v3 = vpop.eup %1938 }
 0x2c6   : > { %v1151_v2 = vadd.f32 %v1150_v63, %v1149_v1 }
 0x2c8   : > { %1157 = vst [vmem:[#allocation3 + $0x8] sm:$0xff] %v1151_v2  ;;  %1940 = vtanh.f32 %v1151_v2 }
 0x2cf   : > { %v1262_v14 = vld [vmem:[#allocation3 + $0x8] sm:$0xff] (!%p1510_p8) }
 0x2d0   : > { %1264 = vst [vmem:[#allocation17 + $0x8] sm:$0xff] (!%p1510_p8), %v1262_v14 }
 0x2d2   : > { %v1941_v4 = vpop.eup %1940 }
 0x2d3   : > { %v1153_v5 = vmul.f32 %v1941_v4, %v1939_v3 }
 0x2d5   : > { %1156 = vst [vmem:[#allocation2 + $0x8] sm:$0xff] %v1153_v5  ;;  %1158 = vst [vmem:[%s2574_s9] sm:$0xff] %v1153_v5  ;;  %1572 = vmatmul.mubr.f32.vlgmr.msra.gmra.mrb[4].mxu0 %v1153_v5 }
 0x2dc   : > { %v1258_v12 = vld [vmem:[#allocation2 + $0x8] sm:$0xff] (!%p1510_p8) }
 0x2dd   : > { %1260 = vst [vmem:[#allocation16 + $0x8] sm:$0xff] (!%p1510_p8), %v1258_v12 }
 0x3a5   : > { %1256 = sbr.rel (%p1510_p8) target bundleno = 940 (0x3ac), region = 76 }
 0x3a8   : > { %v1248_v7 = vpop.f32.mrb[4].mxu0 }
 0x3a9   : > { %v1249_v9 = vadd.f32 %v1509_v6, %v1248_v7  ;;  %v1573_v10 = vpop.f32.mrb[5].mxu0 }
 0x3ab   : > { %1252 = vst [vmem:[%s2576_s26] sm:$0xff] %v1249_v9 }
 0x3ac PF: > { %s1270_s18 = sand.u32 1, %s2347_s19   ;;  %s1513_s22 = sshll.u32 %s2347_s19, 7 }
 0x3ad   : > { %s2605_s23 = scalar_lea.hbm %s2735_s8, %s1513_s22  ;;  %s1297_s11 = sshll.u32 %s2576_s26, 4  ;;  %s2608_s11 = int_to_ptr.vmem [resolvable:$true] %s1297_s11 }
 0x3ae   : > { %s2613_s28 = scalar_lea.hbm %s2734_s7, %s1513_s22  ;;  %s1271_s29 = scalar_lea.sflag [#allocation15], %s1270_s18 }
 0x3af   : > { %s2084_s12 = scalar_lea.vmem %s2608_s11, 128  ;;  %p2764_p9 = scmp.ne.s32.totalorder %s2755_s17, 0 }
 0x3b0   : > { %p2085_p7 = scmp.ne.s32.totalorder %s2608_s11, %s2084_s12  ;;  %s2265_s25 = smov [#allocation14]  }
 0x3b1   : > { %s2088_s24 = sshll.u32 %s2265_s25, 4  ;;  %s2089_s24 = int_to_ptr.vmem [resolvable:$false] %s2088_s24 }
 0x3b2   : > { %p2086_p12 = pnand %p2085_p7, %p2764_p9  ;;  %s2090_s26 = scalar_lea.vmem %s2089_s24, 256 }
 0x3b3   : > { %p2091_p13 = scmp.lt.s32.totalorder %s2608_s11, %s2089_s24  ;;  %p2092_p0 = scmp.lt.s32.totalorder %s2090_s26, %s2084_s12 }
 0x3b4   : > { %p2087_p4 = pneg %p2086_p12 }
 0x3b5   : > { %p2093_p2 = por %p2092_p0, %p2091_p13 }
 0x3b7   : > { %p2094_p5 = pnand %p2093_p2, %p2087_p4 }
 0x3b9   : > { %2097 = shalt.err (!%p2094_p5)
}
 0x3ba   : > { %s2098_s18 = scalar_lea.hbm %s2605_s23, 128  ;;  %s2102_s27 = scalar_lea.hbm %s2735_s8, 1024 }
 0x3bb   : > { %p2099_p3 = scmp.ne.s32.totalorder %s2605_s23, %s2098_s18  ;;  %p2103_p1 = scmp.lt.u32.totalorder %s2605_s23, %s2735_s8 }
 0x3bc   : > { %p2104_p6 = scmp.lt.u32.totalorder %s2102_s27, %s2098_s18  ;;  %p2106_p7 = scmp.lt.u32.totalorder %s2098_s18, %s2605_s23 }
 0x3bd   : > { %p2100_p10 = pnand %p2099_p3, %p2764_p9 }
 0x3be   : > { %p2105_p8 = por %p2104_p6, %p2103_p1 }
 0x3bf   : > { %p2101_p11 = pneg %p2100_p10 }
 0x3c0   : > { %p2107_p12 = por %p2106_p7, %p2105_p8 }
 0x3c2   : > { %p2108_p4 = pnand %p2107_p12, %p2101_p11 }
 0x3c4   : > { %2111 = shalt.err (!%p2108_p4)
}
 0x3c5   : > { %1813 = dma.vmem_to_hbm [thread:$0]  (%p2764_p9), %s2608_s11, 128, %s2605_s23, %s1271_s29  }
 0x3c6   : > { %s1284_s12 = sshll.u32 %s2574_s9, 4  ;;  %s2266_s26 = smov [#allocation16]   ;;  %s2637_s12 = int_to_ptr.vmem [resolvable:$true] %s1284_s12 }
 0x3c7   : > { %s2639_s22 = sshll.u32 %s2266_s26, 4  ;;  %s1266_s18 = scalar_lea.sflag [#allocation6], %s2555_s1  ;;  %s1308_s22 = int_to_ptr.vmem [resolvable:$true] %s2639_s22 }
 0x3c8   : > { %s2112_s20 = scalar_lea.vmem %s2637_s12, 128  ;;  %s2267_s27 = smov [#allocation13]  }
 0x3c9   : > { %p2113_p13 = scmp.ne.s32.totalorder %s2637_s12, %s2112_s20  ;;  %s2116_s25 = sshll.u32 %s2267_s27, 4  ;;  %s2117_s25 = int_to_ptr.vmem [resolvable:$false] %s2116_s25 }
 0x3ca   : > { %s2118_s24 = scalar_lea.vmem %s2117_s25, 256  ;;  %p2119_p5 = scmp.lt.s32.totalorder %s2637_s12, %s2117_s25 }
 0x3cb   : > { %p2114_p0 = pnand %p2113_p13, %p2764_p9  ;;  %p2120_p3 = scmp.lt.s32.totalorder %s2118_s24, %s2112_s20 }
 0x3cd   : > { %p2115_p2 = pneg %p2114_p0  ;;  %p2121_p10 = por %p2120_p3, %p2119_p5 }
 0x3cf   : > { %p2122_p11 = pnand %p2121_p10, %p2115_p2 }
 0x3d1   : > { %2125 = shalt.err (!%p2122_p11)
}
 0x3d2   : > { %s2126_s1 = scalar_lea.hbm %s2613_s28, 128  ;;  %s2130_s11 = scalar_lea.hbm %s2734_s7, 1024 }
 0x3d3   : > { %p2127_p1 = scmp.ne.s32.totalorder %s2613_s28, %s2126_s1  ;;  %p2131_p7 = scmp.lt.u32.totalorder %s2613_s28, %s2734_s7 }
 0x3d4   : > { %p2132_p12 = scmp.lt.u32.totalorder %s2130_s11, %s2126_s1  ;;  %p2134_p13 = scmp.lt.u32.totalorder %s2126_s1, %s2613_s28 }
 0x3d5   : > { %p2128_p6 = pnand %p2127_p1, %p2764_p9 }
 0x3d6   : > { %p2133_p4 = por %p2132_p12, %p2131_p7 }
 0x3d7   : > { %p2129_p8 = pneg %p2128_p6 }
 0x3d8   : > { %p2135_p0 = por %p2134_p13, %p2133_p4 }
 0x3da   : > { %p2136_p2 = pnand %p2135_p0, %p2129_p8 }
 0x3dc   : > { %2139 = shalt.err (!%p2136_p2)
}
 0x3dd   : > { %1812 = dma.vmem_to_hbm [thread:$0]  (%p2764_p9), %s2637_s12, 128, %s2613_s28, %s1266_s18  }
 0x3de   : > { %s2140_s20 = scalar_lea.vmem %s1308_s22, 256  ;;  %p2765_p3 = scmp.eq.s32.totalorder %s2347_s19, 7 }
 0x3df   : > { %p2141_p5 = scmp.ne.s32.totalorder %s1308_s22, %s2140_s20  ;;  %p2147_p1 = scmp.lt.s32.totalorder %s1308_s22, %s1308_s22 }
 0x3e0   : > { %p2148_p6 = scmp.lt.s32.totalorder %s2140_s20, %s2140_s20 }
 0x3e1   : > { %p2142_p10 = pnand %p2141_p5, %p2765_p3 }
 0x3e2   : > { %p2149_p7 = por %p2148_p6, %p2147_p1 }
 0x3e3   : > { %p2143_p11 = pneg %p2142_p10 }
 0x3e5   : > { %p2150_p12 = pnand %p2149_p7, %p2143_p11 }
 0x3e7   : > { %2153 = shalt.err (!%p2150_p12)
}
 0x3e8   : > { %s2766_s24 = sld [smem:[#allocation27_spill]]  ;;  %p2767_p8 = pmov %p2765_p3 }
 0x3ee   : > { %s2154_s17 = scalar_lea.hbm %s2766_s24, 256 }
 0x3ef   : > { %p2155_p9 = scmp.ne.s32.totalorder %s2766_s24, %s2154_s17  ;;  %p2160_p0 = scmp.lt.u32.totalorder %s2154_s17, %s2766_s24 }
 0x3f1   : > { %p2156_p4 = pnand %p2155_p9, %p2767_p8 }
 0x3f3   : > { %p2157_p13 = pneg %p2156_p4 }
 0x3f5   : > { %p2162_p2 = pnand %p2160_p0, %p2157_p13 }
 0x3f7   : > { %2165 = shalt.err (!%p2162_p2)
}
 0x3f8   : > { %s2268_s18 = smov 128   ;;  %s2269_s23 = smov 8  }
 0x3f9   : > { %p2768_p5 = pmov %p2765_p3  ;;  %s2270_s26 = smov [#allocation17]  }
 0x3fa   : > { %s1320_s20 = sshll.u32 %s2270_s26, 4  ;;  %s1321_s20 = int_to_ptr.vmem [resolvable:$true] %s1320_s20 }
 0x3fb   : > { %1815 = dma.vmem_to_hbm [thread:$0]  (%p2768_p5), %s1308_s22, 256, %s2766_s24, [#allocation15], %s2268_s18, %s2268_s18, %s2269_s23  }
 0x3fc   : > { %s2166_s27 = scalar_lea.vmem %s1321_s20, 256  ;;  %p2769_p10 = pmov %p2768_p5 }
 0x3fd   : > { %p2167_p3 = scmp.ne.s32.totalorder %s1321_s20, %s2166_s27  ;;  %p2173_p6 = scmp.lt.s32.totalorder %s1321_s20, %s1321_s20 }
 0x3fe   : > { %p2174_p7 = scmp.lt.s32.totalorder %s2166_s27, %s2166_s27 }
 0x3ff   : > { %p2168_p11 = pnand %p2167_p3, %p2769_p10 }
 0x400   : > { %p2175_p12 = por %p2174_p7, %p2173_p6 }
 0x401   : > { %p2169_p1 = pneg %p2168_p11 }
 0x403   : > { %p2176_p9 = pnand %p2175_p12, %p2169_p1 }
 0x405   : > { %2179 = shalt.err (!%p2176_p9)
}
 0x406   : > { %s2770_s1 = sld [smem:[#allocation28_spill]]  ;;  %p2771_p4 = pmov %p2768_p5 }
 0x40c   : > { %s2180_s9 = scalar_lea.hbm %s2770_s1, 256 }
 0x40d   : > { %p2181_p8 = scmp.ne.s32.totalorder %s2770_s1, %s2180_s9  ;;  %p2186_p2 = scmp.lt.u32.totalorder %s2180_s9, %s2770_s1 }
 0x40f   : > { %p2182_p13 = pnand %p2181_p8, %p2771_p4 }
 0x411   : > { %p2183_p0 = pneg %p2182_p13 }
 0x413   : > { %p2188_p5 = pnand %p2186_p2, %p2183_p0 }
 0x415   : > { %2191 = shalt.err (!%p2188_p5)
}
 0x416   : > { %p2772_p3 = pmov %p2771_p4 }
 0x418   : > { %1817 = dma.vmem_to_hbm [thread:$0]  (%p2772_p3), %s1321_s20, 256, %s2770_s1, [#allocation18], %s2268_s18, %s2268_s18, %s2269_s23  }
 0x419   : > { %p2773_p10 = pmov %p2772_p3 }
 0x41a   : > { %p2774_p11 = pmov %p2772_p3 }
 0x41b   : > { %2221 = dma.done.wait (%p2773_p10), [#allocation15], 256  }
 0x41c   : > { %2223 = vsyncadd (%p2774_p11), [#allocation15], 4294967040  ;;  %p2775_p1 = pmov %p2772_p3 }
 0x41e   : > { %2225 = dma.done.wait (%p2775_p1), [#allocation18], 256   ;;  %p2776_p6 = pmov %p2775_p1 }
 0x420   : > { %2227 = vsyncadd (%p2776_p6), [#allocation18], 4294967040 }
 0x421 PF: > { %p1861_p7 = scmp.ge.s32.totalorder %s2250_s16, 2  ;;  %s1343_s27 = sand.u32 1, %s2238_s13  }
 0x422   : > { %p2777_p12 = scmp.ne.s32.totalorder %s2756_s21, 0  ;;  %s1344_s18 = scalar_lea.sflag [#allocation6], %s1343_s27 }
 0x424   : > { %p1842_p9 = pnand %p1861_p7, %p2777_p12 }
 0x426   : > { %2229 = dma.done.wait (!%p1842_p9), %s1344_s18, 128  }
 0x427   : > { %2231 = vsyncadd (!%p1842_p9), %s1344_s18, 4294967168  ;;  %s2778_s23 = sadd.s32 4294967294, %s2250_s16  }
 0x428   : > { %s1352_s20 = sand.u32 1, %s2778_s23  }
 0x429   : > { %s1353_s25 = scalar_lea.sflag [#allocation15], %s1352_s20 }
 0x42a   : > { %2233 = dma.done.wait (!%p1842_p9), %s1353_s25, 128  }
 0x42b   : > { %2235 = vsyncadd (!%p1842_p9), %s1353_s25, 4294967168  ;;  %p30_p8 = scmp.ge.s32.totalorder %s2475_s10, 10   ;;  %s2779_s13 = smov %s2242_s14 }
 0x42c   : > { %s2780_s14 = smov %s2246_s15  ;;  %s2781_s15 = smov %s2486_s30 }
 0x42d   : > { %s2782_s16 = smov %s2475_s10  ;;  %32 = sbr.rel (!%p30_p8) target bundleno = 14 (0xe), region = 152 }
 0x434   :  { %1358 = vsyncpa [#allocation5], 1 }
 0x435   :  { %1360 = vsyncpa [#allocation5 + $0x1], 1 }
 0x436   :  { %1361 = vsyncpa [#allocation8], 1 }
 0x437   :  { %1362 = vsyncpa [#allocation11], 1 }
 0x438   :  { %1363 = vsyncpa [#allocation6], 1 }
 0x439   :  { %1365 = vsyncpa [#allocation6 + $0x1], 1 }
 0x43a   :  { %1366 = vsyncpa [#allocation15], 1 }
 0x43b   :  { %1368 = vsyncpa [#allocation15 + $0x1], 1 }
 0x43c   :  { %1369 = vsyncpa [#allocation18], 1 }

</bundles_post_ra>
